<compile_context>
chip_gen: v6e
topology: v6e:2x2x1
jax: 0.10.0
libtpu: 0.0.40
codegen_flags: <defaults>
</compile_context>

<pallas_src>
import functools

import jax
import jax.numpy as jnp
from jax import lax
from jax.experimental import pallas as pl
from jax.experimental.pallas import tpu as pltpu


# ----------------------------- trace-time helpers -------------------------- #

def _round_up(n, m):
    return ((n + m - 1) // m) * m


def _fista_momentum_coeffs(n_iters):
    """(t_k - 1) / t_{k+1} for k = 0..n-1 with t_0 = 1 (Python floats)."""
    coeffs = []
    t = 1.0
    for _ in range(n_iters):
        t_next = 0.5 * (1.0 + (1.0 + 4.0 * t * t) ** 0.5)
        coeffs.append((t - 1.0) / t_next)
        t = t_next
    return tuple(coeffs)


# ----------------------------- Pallas kernel ------------------------------- #

def pfc_kernel(xtw_ref, wtw_ref, wy_ref, h0_ref, yT_ref, h_ref, *, momentum_phases):
    """One batch-tile of PFC forward: FISTA NMF right-update + y^T = h @ Wy^T.

    xtw_ref : (Bt, K)   = (1/L) * x_tile^T @ Wx   (pre-scaled, loop-invariant)
    wtw_ref : (K, K)    = (1/L) * Wx^T @ Wx       (pre-scaled, loop-invariant)
    wy_ref  : (y_dim, K)
    h0_ref  : (Bt, K)   noisy non-negative init
    """
    xtw = xtw_ref[...]
    wtw = wtw_ref[...]
    wy = wy_ref[...]
    h = h0_ref[...]

    # Two FISTA phases (no-grad warm-up, then grad phase), momentum restarted
    # at the start of each phase -- mirrors the two fista_right_update calls.
    for coeffs in momentum_phases:
        h_prev = h
        z = h
        for c in coeffs:  # fully unrolled; c are Python float constants
            # grad wrt h, pre-scaled by 1/L:  z @ (Wx^T Wx)/L - (x^T Wx)/L
            grad = lax.dot_general(z, wtw, (((1,), (0,)), ((), ())),
                                   preferred_element_type=jnp.float32) - xtw
            h_new = jnp.maximum(z - grad, 0.0)        # proximal step (ReLU proj)
            if c == 0.0:
                z = h_new                              # first iter: no momentum
            else:
                z = h_new + c * (h_new - h_prev)      # Nesterov momentum
            h_prev = h_new
        h = h_prev

    h_ref[...] = h
    # y_pred^T = h @ Wy^T  (contract on K without an explicit transpose)
    yT_ref[...] = lax.dot_general(h, wy, (((1,), (1,)), ((), ())),
                                  preferred_element_type=jnp.float32)


# ------------------------------ JAX wrapper -------------------------------- #

def pfc_forward(x, Wx, Wy, h0, *, iters_no_grad, iters_with_grad,
                y_targets=None, block_b=256):
    """PFCBlock.forward.

    Args:
      x:  (x_dim, batch) float32
      Wx: (x_dim, K) float32, Wy: (y_dim, K) float32
      h0: (batch, K) float32 noisy init for h_tran
    Returns:
      y_pred (y_dim, batch) [, loss scalar if y_targets is given]
    """
    x_dim, batch = x.shape
    K = Wx.shape[1]
    y_dim = Wy.shape[0]

    x = x.astype(jnp.float32)
    Wx = Wx.astype(jnp.float32)
    Wy = Wy.astype(jnp.float32)
    h0 = h0.astype(jnp.float32)

    # ---- loop-invariant precompute (hoisted out of the kernel) ---- #
    wtw = Wx.T @ Wx                                       # (K, K), symmetric PSD
    lam = jnp.linalg.eigvalsh(wtw)[-1]                    # Lipschitz constant L
    linv = 1.0 / jnp.maximum(lam, 1e-12)
    wtw_s = wtw * linv                                    # (K, K)   pre-scaled
    xtw_s = (x.T @ Wx) * linv                             # (B, K)   pre-scaled

    # FISTA momentum coefficients are data-independent -> trace-time constants.
    momentum_phases = (_fista_momentum_coeffs(iters_no_grad),
                       _fista_momentum_coeffs(iters_with_grad))

    # ---- batch tiling ("parallel" grid so both TCs get work on v7x) ---- #
    bb = min(block_b, _round_up(batch, 8))
    bb = _round_up(bb, 8)                                 # sublane-aligned tile
    b_pad = _round_up(batch, bb)
    if b_pad != batch:
        pad = b_pad - batch
        xtw_s = jnp.pad(xtw_s, ((0, pad), (0, 0)))        # padded rows stay 0
        h0p = jnp.pad(h0, ((0, pad), (0, 0)))
    else:
        h0p = h0
    grid = (b_pad // bb,)

    kernel = functools.partial(pfc_kernel, momentum_phases=momentum_phases)

    yT, h_tran = pl.pallas_call(
        kernel,
        out_shape=(jax.ShapeDtypeStruct((b_pad, y_dim), jnp.float32),
                   jax.ShapeDtypeStruct((b_pad, K), jnp.float32)),
        grid_spec=pltpu.PrefetchScalarGridSpec(
            num_scalar_prefetch=0,
            grid=grid,
            in_specs=[
                pl.BlockSpec((bb, K), lambda i: (i, 0)),      # xtw_s (batch tile)
                pl.BlockSpec((K, K), lambda i: (0, 0)),       # wtw_s (resident)
                pl.BlockSpec((y_dim, K), lambda i: (0, 0)),   # Wy    (resident)
                pl.BlockSpec((bb, K), lambda i: (i, 0)),      # h0    (batch tile)
            ],
            out_specs=(
                pl.BlockSpec((bb, y_dim), lambda i: (i, 0)),  # y^T
                pl.BlockSpec((bb, K), lambda i: (i, 0)),      # h_tran
            ),
        ),
        compiler_params=pltpu.CompilerParams(
            dimension_semantics=("parallel",),
        ),
    )(xtw_s, wtw_s, Wy, h0p)

    y_pred = yT[:batch].T                                 # (y_dim, batch)
    # h_tran[:batch] corresponds to self.h_tran / self.h_tran_copy (not returned).

    if y_targets is None:
        return y_pred
    # loss_type == 'labels_mse' (glue; tiny elementwise reduction)
    # TODO(synk): 'images_labels_mse' branch (Wx @ h reconstruction loss) not wired up.
    loss = jnp.mean((y_pred - y_targets) ** 2)
    return y_pred, loss


# --------------------------------- main ------------------------------------ #

if __name__ == "__main__":
    # Small config consistent with the module's __init__ / forward.
    x_dim = 64
    basis_vector_count = 32
    y_dim = 16
    batch = 8
    weights_noise_scale = 0.1
    h_noise_scale = 0.1
    nmf_inference_iters_no_grad = 20
    nmf_gradient_iters_with_grad = 5
    # TODO(synk): fista_tolerance-based early stopping and
    # enable_h_column_normalization scaling are not implemented (fixed iteration
    # count, normalization disabled), matching a config with those options off.

    key = jax.random.PRNGKey(0)
    k_wx, k_wy, k_x, k_h = jax.random.split(key, 4)

    # Deterministic parameter init mirroring torch.rand(...) * weights_noise_scale.
    Wx = jax.random.uniform(k_wx, (x_dim, basis_vector_count), jnp.float32) * weights_noise_scale
    Wy = jax.random.uniform(k_wy, (y_dim, basis_vector_count), jnp.float32) * weights_noise_scale

    # Non-negative input (NMF setting), shape (x_dim, batch) as in the module.
    x = jax.random.uniform(k_x, (x_dim, batch), jnp.float32)
    # h_tran noisy init, shape (batch, basis_vector_count).
    h0 = jax.random.uniform(k_h, (batch, basis_vector_count), jnp.float32) * h_noise_scale

    pfc_forward_jit = jax.jit(
        pfc_forward,
        static_argnames=("iters_no_grad", "iters_with_grad", "block_b"))

    y_pred = pfc_forward_jit(
        x, Wx, Wy, h0,
        iters_no_grad=nmf_inference_iters_no_grad,
        iters_with_grad=nmf_gradient_iters_with_grad,
    )
    jax.block_until_ready(y_pred)
    assert y_pred.shape == (y_dim, batch)

    # Also exercise the loss branch once.
    y_targets = jax.random.uniform(jax.random.PRNGKey(1), (y_dim, batch), jnp.float32)
    y_pred2, loss = pfc_forward_jit(
        x, Wx, Wy, h0,
        iters_no_grad=nmf_inference_iters_no_grad,
        iters_with_grad=nmf_gradient_iters_with_grad,
        y_targets=y_targets,
    )
    jax.block_until_ready((y_pred2, loss))
    assert y_pred2.shape == (y_dim, batch)
    assert loss.shape == ()

    print("KERNEL_OK")
</pallas_src>

<mosaic_0001>
module attributes {stable_mosaic.version = 11 : i64} {
  func.func @pfc_kernel(%arg0: i32, %arg1: memref<8x32xf32, #tpu.memory_space<vmem>>, %arg2: memref<32x32xf32, #tpu.memory_space<vmem>>, %arg3: memref<16x32xf32, #tpu.memory_space<vmem>>, %arg4: memref<8x32xf32, #tpu.memory_space<vmem>>, %arg5: memref<8x16xf32, #tpu.memory_space<vmem>>, %arg6: memref<8x32xf32, #tpu.memory_space<vmem>>) attributes {dimension_semantics = [#tpu.dimension_semantics<parallel>], iteration_bounds = array<i64: 1>, scalar_prefetch = 0 : i64, scratch_operands = 0 : i64, tpu.core_type = #tpu.core_type<tc>, window_params = [{transform_indices = @transform_0, window_bounds = array<i64: 8, 32>}, {pipeline_mode = #tpu.pipeline_mode<synchronous>, transform_indices = @transform_1, window_bounds = array<i64: 32, 32>}, {pipeline_mode = #tpu.pipeline_mode<synchronous>, transform_indices = @transform_2, window_bounds = array<i64: 16, 32>}, {transform_indices = @transform_3, window_bounds = array<i64: 8, 32>}, {transform_indices = @transform_4, window_bounds = array<i64: 8, 16>}, {transform_indices = @transform_5, window_bounds = array<i64: 8, 32>}]} {
    %c0 = arith.constant 0 : index
    %c0_0 = arith.constant 0 : index
    %0 = vector.load %arg1[%c0, %c0_0] : memref<8x32xf32, #tpu.memory_space<vmem>>, vector<8x32xf32>
    %c0_1 = arith.constant 0 : index
    %c0_2 = arith.constant 0 : index
    %1 = vector.load %arg2[%c0_1, %c0_2] : memref<32x32xf32, #tpu.memory_space<vmem>>, vector<32x32xf32>
    %c0_3 = arith.constant 0 : index
    %c0_4 = arith.constant 0 : index
    %2 = vector.load %arg3[%c0_3, %c0_4] : memref<16x32xf32, #tpu.memory_space<vmem>>, vector<16x32xf32>
    %c0_5 = arith.constant 0 : index
    %c0_6 = arith.constant 0 : index
    %3 = vector.load %arg4[%c0_5, %c0_6] : memref<8x32xf32, #tpu.memory_space<vmem>>, vector<8x32xf32>
    %cst = arith.constant dense<0.000000e+00> : vector<8x32xf32>
    %4 = tpu.matmul %3, %1, %cst {dimension_numbers = #tpu.dot_dimension_numbers<[1], [0], [0], [1], [0, 0, 1, 1], [], []>} : vector<8x32xf32>, vector<32x32xf32>, vector<8x32xf32> -> vector<8x32xf32>
    %5 = arith.subf %4, %0 : vector<8x32xf32>
    %6 = arith.subf %3, %5 : vector<8x32xf32>
    %cst_7 = arith.constant 0.000000e+00 : f32
    %7 = vector.broadcast %cst_7 : f32 to vector<8x32xf32>
    %8 = arith.maximumf %6, %7 : vector<8x32xf32>
    %cst_8 = arith.constant dense<0.000000e+00> : vector<8x32xf32>
    %9 = tpu.matmul %8, %1, %cst_8 {dimension_numbers = #tpu.dot_dimension_numbers<[1], [0], [0], [1], [0, 0, 1, 1], [], []>} : vector<8x32xf32>, vector<32x32xf32>, vector<8x32xf32> -> vector<8x32xf32>
    %10 = arith.subf %9, %0 : vector<8x32xf32>
    %11 = arith.subf %8, %10 : vector<8x32xf32>
    %cst_9 = arith.constant 0.000000e+00 : f32
    %12 = vector.broadcast %cst_9 : f32 to vector<8x32xf32>
    %13 = arith.maximumf %11, %12 : vector<8x32xf32>
    %14 = arith.subf %13, %8 : vector<8x32xf32>
    %cst_10 = arith.constant 0.28175351 : f32
    %15 = vector.broadcast %cst_10 : f32 to vector<8x32xf32>
    %16 = arith.mulf %15, %14 : vector<8x32xf32>
    %17 = arith.addf %13, %16 : vector<8x32xf32>
    %cst_11 = arith.constant dense<0.000000e+00> : vector<8x32xf32>
    %18 = tpu.matmul %17, %1, %cst_11 {dimension_numbers = #tpu.dot_dimension_numbers<[1], [0], [0], [1], [0, 0, 1, 1], [], []>} : vector<8x32xf32>, vector<32x32xf32>, vector<8x32xf32> -> vector<8x32xf32>
    %19 = arith.subf %18, %0 : vector<8x32xf32>
    %20 = arith.subf %17, %19 : vector<8x32xf32>
    %cst_12 = arith.constant 0.000000e+00 : f32
    %21 = vector.broadcast %cst_12 : f32 to vector<8x32xf32>
    %22 = arith.maximumf %20, %21 : vector<8x32xf32>
    %23 = arith.subf %22, %13 : vector<8x32xf32>
    %cst_13 = arith.constant 0.434042782 : f32
    %24 = vector.broadcast %cst_13 : f32 to vector<8x32xf32>
    %25 = arith.mulf %24, %23 : vector<8x32xf32>
    %26 = arith.addf %22, %25 : vector<8x32xf32>
    %cst_14 = arith.constant dense<0.000000e+00> : vector<8x32xf32>
    %27 = tpu.matmul %26, %1, %cst_14 {dimension_numbers = #tpu.dot_dimension_numbers<[1], [0], [0], [1], [0, 0, 1, 1], [], []>} : vector<8x32xf32>, vector<32x32xf32>, vector<8x32xf32> -> vector<8x32xf32>
    %28 = arith.subf %27, %0 : vector<8x32xf32>
    %29 = arith.subf %26, %28 : vector<8x32xf32>
    %cst_15 = arith.constant 0.000000e+00 : f32
    %30 = vector.broadcast %cst_15 : f32 to vector<8x32xf32>
    %31 = arith.maximumf %29, %30 : vector<8x32xf32>
    %32 = arith.subf %31, %22 : vector<8x32xf32>
    %cst_16 = arith.constant 0.531063795 : f32
    %33 = vector.broadcast %cst_16 : f32 to vector<8x32xf32>
    %34 = arith.mulf %33, %32 : vector<8x32xf32>
    %35 = arith.addf %31, %34 : vector<8x32xf32>
    %cst_17 = arith.constant dense<0.000000e+00> : vector<8x32xf32>
    %36 = tpu.matmul %35, %1, %cst_17 {dimension_numbers = #tpu.dot_dimension_numbers<[1], [0], [0], [1], [0, 0, 1, 1], [], []>} : vector<8x32xf32>, vector<32x32xf32>, vector<8x32xf32> -> vector<8x32xf32>
    %37 = arith.subf %36, %0 : vector<8x32xf32>
    %38 = arith.subf %35, %37 : vector<8x32xf32>
    %cst_18 = arith.constant 0.000000e+00 : f32
    %39 = vector.broadcast %cst_18 : f32 to vector<8x32xf32>
    %40 = arith.maximumf %38, %39 : vector<8x32xf32>
    %41 = arith.subf %40, %31 : vector<8x32xf32>
    %cst_19 = arith.constant 0.598778605 : f32
    %42 = vector.broadcast %cst_19 : f32 to vector<8x32xf32>
    %43 = arith.mulf %42, %41 : vector<8x32xf32>
    %44 = arith.addf %40, %43 : vector<8x32xf32>
    %cst_20 = arith.constant dense<0.000000e+00> : vector<8x32xf32>
    %45 = tpu.matmul %44, %1, %cst_20 {dimension_numbers = #tpu.dot_dimension_numbers<[1], [0], [0], [1], [0, 0, 1, 1], [], []>} : vector<8x32xf32>, vector<32x32xf32>, vector<8x32xf32> -> vector<8x32xf32>
    %46 = arith.subf %45, %0 : vector<8x32xf32>
    %47 = arith.subf %44, %46 : vector<8x32xf32>
    %cst_21 = arith.constant 0.000000e+00 : f32
    %48 = vector.broadcast %cst_21 : f32 to vector<8x32xf32>
    %49 = arith.maximumf %47, %48 : vector<8x32xf32>
    %50 = arith.subf %49, %40 : vector<8x32xf32>
    %cst_22 = arith.constant 0.648923337 : f32
    %51 = vector.broadcast %cst_22 : f32 to vector<8x32xf32>
    %52 = arith.mulf %51, %50 : vector<8x32xf32>
    %53 = arith.addf %49, %52 : vector<8x32xf32>
    %cst_23 = arith.constant dense<0.000000e+00> : vector<8x32xf32>
    %54 = tpu.matmul %53, %1, %cst_23 {dimension_numbers = #tpu.dot_dimension_numbers<[1], [0], [0], [1], [0, 0, 1, 1], [], []>} : vector<8x32xf32>, vector<32x32xf32>, vector<8x32xf32> -> vector<8x32xf32>
    %55 = arith.subf %54, %0 : vector<8x32xf32>
    %56 = arith.subf %53, %55 : vector<8x32xf32>
    %cst_24 = arith.constant 0.000000e+00 : f32
    %57 = vector.broadcast %cst_24 : f32 to vector<8x32xf32>
    %58 = arith.maximumf %56, %57 : vector<8x32xf32>
    %59 = arith.subf %58, %49 : vector<8x32xf32>
    %cst_25 = arith.constant 0.687645852 : f32
    %60 = vector.broadcast %cst_25 : f32 to vector<8x32xf32>
    %61 = arith.mulf %60, %59 : vector<8x32xf32>
    %62 = arith.addf %58, %61 : vector<8x32xf32>
    %cst_26 = arith.constant dense<0.000000e+00> : vector<8x32xf32>
    %63 = tpu.matmul %62, %1, %cst_26 {dimension_numbers = #tpu.dot_dimension_numbers<[1], [0], [0], [1], [0, 0, 1, 1], [], []>} : vector<8x32xf32>, vector<32x32xf32>, vector<8x32xf32> -> vector<8x32xf32>
    %64 = arith.subf %63, %0 : vector<8x32xf32>
    %65 = arith.subf %62, %64 : vector<8x32xf32>
    %cst_27 = arith.constant 0.000000e+00 : f32
    %66 = vector.broadcast %cst_27 : f32 to vector<8x32xf32>
    %67 = arith.maximumf %65, %66 : vector<8x32xf32>
    %68 = arith.subf %67, %58 : vector<8x32xf32>
    %cst_28 = arith.constant 0.718499839 : f32
    %69 = vector.broadcast %cst_28 : f32 to vector<8x32xf32>
    %70 = arith.mulf %69, %68 : vector<8x32xf32>
    %71 = arith.addf %67, %70 : vector<8x32xf32>
    %cst_29 = arith.constant dense<0.000000e+00> : vector<8x32xf32>
    %72 = tpu.matmul %71, %1, %cst_29 {dimension_numbers = #tpu.dot_dimension_numbers<[1], [0], [0], [1], [0, 0, 1, 1], [], []>} : vector<8x32xf32>, vector<32x32xf32>, vector<8x32xf32> -> vector<8x32xf32>
    %73 = arith.subf %72, %0 : vector<8x32xf32>
    %74 = arith.subf %71, %73 : vector<8x32xf32>
    %cst_30 = arith.constant 0.000000e+00 : f32
    %75 = vector.broadcast %cst_30 : f32 to vector<8x32xf32>
    %76 = arith.maximumf %74, %75 : vector<8x32xf32>
    %77 = arith.subf %76, %67 : vector<8x32xf32>
    %cst_31 = arith.constant 7.436910e-01 : f32
    %78 = vector.broadcast %cst_31 : f32 to vector<8x32xf32>
    %79 = arith.mulf %78, %77 : vector<8x32xf32>
    %80 = arith.addf %76, %79 : vector<8x32xf32>
    %cst_32 = arith.constant dense<0.000000e+00> : vector<8x32xf32>
    %81 = tpu.matmul %80, %1, %cst_32 {dimension_numbers = #tpu.dot_dimension_numbers<[1], [0], [0], [1], [0, 0, 1, 1], [], []>} : vector<8x32xf32>, vector<32x32xf32>, vector<8x32xf32> -> vector<8x32xf32>
    %82 = arith.subf %81, %0 : vector<8x32xf32>
    %83 = arith.subf %80, %82 : vector<8x32xf32>
    %cst_33 = arith.constant 0.000000e+00 : f32
    %84 = vector.broadcast %cst_33 : f32 to vector<8x32xf32>
    %85 = arith.maximumf %83, %84 : vector<8x32xf32>
    %86 = arith.subf %85, %76 : vector<8x32xf32>
    %cst_34 = arith.constant 0.764664709 : f32
    %87 = vector.broadcast %cst_34 : f32 to vector<8x32xf32>
    %88 = arith.mulf %87, %86 : vector<8x32xf32>
    %89 = arith.addf %85, %88 : vector<8x32xf32>
    %cst_35 = arith.constant dense<0.000000e+00> : vector<8x32xf32>
    %90 = tpu.matmul %89, %1, %cst_35 {dimension_numbers = #tpu.dot_dimension_numbers<[1], [0], [0], [1], [0, 0, 1, 1], [], []>} : vector<8x32xf32>, vector<32x32xf32>, vector<8x32xf32> -> vector<8x32xf32>
    %91 = arith.subf %90, %0 : vector<8x32xf32>
    %92 = arith.subf %89, %91 : vector<8x32xf32>
    %cst_36 = arith.constant 0.000000e+00 : f32
    %93 = vector.broadcast %cst_36 : f32 to vector<8x32xf32>
    %94 = arith.maximumf %92, %93 : vector<8x32xf32>
    %95 = arith.subf %94, %85 : vector<8x32xf32>
    %cst_37 = arith.constant 0.78240925 : f32
    %96 = vector.broadcast %cst_37 : f32 to vector<8x32xf32>
    %97 = arith.mulf %96, %95 : vector<8x32xf32>
    %98 = arith.addf %94, %97 : vector<8x32xf32>
    %cst_38 = arith.constant dense<0.000000e+00> : vector<8x32xf32>
    %99 = tpu.matmul %98, %1, %cst_38 {dimension_numbers = #tpu.dot_dimension_numbers<[1], [0], [0], [1], [0, 0, 1, 1], [], []>} : vector<8x32xf32>, vector<32x32xf32>, vector<8x32xf32> -> vector<8x32xf32>
    %100 = arith.subf %99, %0 : vector<8x32xf32>
    %101 = arith.subf %98, %100 : vector<8x32xf32>
    %cst_39 = arith.constant 0.000000e+00 : f32
    %102 = vector.broadcast %cst_39 : f32 to vector<8x32xf32>
    %103 = arith.maximumf %101, %102 : vector<8x32xf32>
    %104 = arith.subf %103, %94 : vector<8x32xf32>
    %cst_40 = arith.constant 0.797624409 : f32
    %105 = vector.broadcast %cst_40 : f32 to vector<8x32xf32>
    %106 = arith.mulf %105, %104 : vector<8x32xf32>
    %107 = arith.addf %103, %106 : vector<8x32xf32>
    %cst_41 = arith.constant dense<0.000000e+00> : vector<8x32xf32>
    %108 = tpu.matmul %107, %1, %cst_41 {dimension_numbers = #tpu.dot_dimension_numbers<[1], [0], [0], [1], [0, 0, 1, 1], [], []>} : vector<8x32xf32>, vector<32x32xf32>, vector<8x32xf32> -> vector<8x32xf32>
    %109 = arith.subf %108, %0 : vector<8x32xf32>
    %110 = arith.subf %107, %109 : vector<8x32xf32>
    %cst_42 = arith.constant 0.000000e+00 : f32
    %111 = vector.broadcast %cst_42 : f32 to vector<8x32xf32>
    %112 = arith.maximumf %110, %111 : vector<8x32xf32>
    %113 = arith.subf %112, %103 : vector<8x32xf32>
    %cst_43 = arith.constant 0.810819983 : f32
    %114 = vector.broadcast %cst_43 : f32 to vector<8x32xf32>
    %115 = arith.mulf %114, %113 : vector<8x32xf32>
    %116 = arith.addf %112, %115 : vector<8x32xf32>
    %cst_44 = arith.constant dense<0.000000e+00> : vector<8x32xf32>
    %117 = tpu.matmul %116, %1, %cst_44 {dimension_numbers = #tpu.dot_dimension_numbers<[1], [0], [0], [1], [0, 0, 1, 1], [], []>} : vector<8x32xf32>, vector<32x32xf32>, vector<8x32xf32> -> vector<8x32xf32>
    %118 = arith.subf %117, %0 : vector<8x32xf32>
    %119 = arith.subf %116, %118 : vector<8x32xf32>
    %cst_45 = arith.constant 0.000000e+00 : f32
    %120 = vector.broadcast %cst_45 : f32 to vector<8x32xf32>
    %121 = arith.maximumf %119, %120 : vector<8x32xf32>
    %122 = arith.subf %121, %112 : vector<8x32xf32>
    %cst_46 = arith.constant 0.822376668 : f32
    %123 = vector.broadcast %cst_46 : f32 to vector<8x32xf32>
    %124 = arith.mulf %123, %122 : vector<8x32xf32>
    %125 = arith.addf %121, %124 : vector<8x32xf32>
    %cst_47 = arith.constant dense<0.000000e+00> : vector<8x32xf32>
    %126 = tpu.matmul %125, %1, %cst_47 {dimension_numbers = #tpu.dot_dimension_numbers<[1], [0], [0], [1], [0, 0, 1, 1], [], []>} : vector<8x32xf32>, vector<32x32xf32>, vector<8x32xf32> -> vector<8x32xf32>
    %127 = arith.subf %126, %0 : vector<8x32xf32>
    %128 = arith.subf %125, %127 : vector<8x32xf32>
    %cst_48 = arith.constant 0.000000e+00 : f32
    %129 = vector.broadcast %cst_48 : f32 to vector<8x32xf32>
    %130 = arith.maximumf %128, %129 : vector<8x32xf32>
    %131 = arith.subf %130, %121 : vector<8x32xf32>
    %cst_49 = arith.constant 0.832584381 : f32
    %132 = vector.broadcast %cst_49 : f32 to vector<8x32xf32>
    %133 = arith.mulf %132, %131 : vector<8x32xf32>
    %134 = arith.addf %130, %133 : vector<8x32xf32>
    %cst_50 = arith.constant dense<0.000000e+00> : vector<8x32xf32>
    %135 = tpu.matmul %134, %1, %cst_50 {dimension_numbers = #tpu.dot_dimension_numbers<[1], [0], [0], [1], [0, 0, 1, 1], [], []>} : vector<8x32xf32>, vector<32x32xf32>, vector<8x32xf32> -> vector<8x32xf32>
    %136 = arith.subf %135, %0 : vector<8x32xf32>
    %137 = arith.subf %134, %136 : vector<8x32xf32>
    %cst_51 = arith.constant 0.000000e+00 : f32
    %138 = vector.broadcast %cst_51 : f32 to vector<8x32xf32>
    %139 = arith.maximumf %137, %138 : vector<8x32xf32>
    %140 = arith.subf %139, %130 : vector<8x32xf32>
    %cst_52 = arith.constant 0.841668248 : f32
    %141 = vector.broadcast %cst_52 : f32 to vector<8x32xf32>
    %142 = arith.mulf %141, %140 : vector<8x32xf32>
    %143 = arith.addf %139, %142 : vector<8x32xf32>
    %cst_53 = arith.constant dense<0.000000e+00> : vector<8x32xf32>
    %144 = tpu.matmul %143, %1, %cst_53 {dimension_numbers = #tpu.dot_dimension_numbers<[1], [0], [0], [1], [0, 0, 1, 1], [], []>} : vector<8x32xf32>, vector<32x32xf32>, vector<8x32xf32> -> vector<8x32xf32>
    %145 = arith.subf %144, %0 : vector<8x32xf32>
    %146 = arith.subf %143, %145 : vector<8x32xf32>
    %cst_54 = arith.constant 0.000000e+00 : f32
    %147 = vector.broadcast %cst_54 : f32 to vector<8x32xf32>
    %148 = arith.maximumf %146, %147 : vector<8x32xf32>
    %149 = arith.subf %148, %139 : vector<8x32xf32>
    %cst_55 = arith.constant 0.849805533 : f32
    %150 = vector.broadcast %cst_55 : f32 to vector<8x32xf32>
    %151 = arith.mulf %150, %149 : vector<8x32xf32>
    %152 = arith.addf %148, %151 : vector<8x32xf32>
    %cst_56 = arith.constant dense<0.000000e+00> : vector<8x32xf32>
    %153 = tpu.matmul %152, %1, %cst_56 {dimension_numbers = #tpu.dot_dimension_numbers<[1], [0], [0], [1], [0, 0, 1, 1], [], []>} : vector<8x32xf32>, vector<32x32xf32>, vector<8x32xf32> -> vector<8x32xf32>
    %154 = arith.subf %153, %0 : vector<8x32xf32>
    %155 = arith.subf %152, %154 : vector<8x32xf32>
    %cst_57 = arith.constant 0.000000e+00 : f32
    %156 = vector.broadcast %cst_57 : f32 to vector<8x32xf32>
    %157 = arith.maximumf %155, %156 : vector<8x32xf32>
    %158 = arith.subf %157, %148 : vector<8x32xf32>
    %cst_58 = arith.constant 0.857137918 : f32
    %159 = vector.broadcast %cst_58 : f32 to vector<8x32xf32>
    %160 = arith.mulf %159, %158 : vector<8x32xf32>
    %161 = arith.addf %157, %160 : vector<8x32xf32>
    %cst_59 = arith.constant dense<0.000000e+00> : vector<8x32xf32>
    %162 = tpu.matmul %161, %1, %cst_59 {dimension_numbers = #tpu.dot_dimension_numbers<[1], [0], [0], [1], [0, 0, 1, 1], [], []>} : vector<8x32xf32>, vector<32x32xf32>, vector<8x32xf32> -> vector<8x32xf32>
    %163 = arith.subf %162, %0 : vector<8x32xf32>
    %164 = arith.subf %161, %163 : vector<8x32xf32>
    %cst_60 = arith.constant 0.000000e+00 : f32
    %165 = vector.broadcast %cst_60 : f32 to vector<8x32xf32>
    %166 = arith.maximumf %164, %165 : vector<8x32xf32>
    %167 = arith.subf %166, %157 : vector<8x32xf32>
    %cst_61 = arith.constant 0.86378014 : f32
    %168 = vector.broadcast %cst_61 : f32 to vector<8x32xf32>
    %169 = arith.mulf %168, %167 : vector<8x32xf32>
    %170 = arith.addf %166, %169 : vector<8x32xf32>
    %cst_62 = arith.constant dense<0.000000e+00> : vector<8x32xf32>
    %171 = tpu.matmul %170, %1, %cst_62 {dimension_numbers = #tpu.dot_dimension_numbers<[1], [0], [0], [1], [0, 0, 1, 1], [], []>} : vector<8x32xf32>, vector<32x32xf32>, vector<8x32xf32> -> vector<8x32xf32>
    %172 = arith.subf %171, %0 : vector<8x32xf32>
    %173 = arith.subf %170, %172 : vector<8x32xf32>
    %cst_63 = arith.constant 0.000000e+00 : f32
    %174 = vector.broadcast %cst_63 : f32 to vector<8x32xf32>
    %175 = arith.maximumf %173, %174 : vector<8x32xf32>
    %cst_64 = arith.constant dense<0.000000e+00> : vector<8x32xf32>
    %176 = tpu.matmul %175, %1, %cst_64 {dimension_numbers = #tpu.dot_dimension_numbers<[1], [0], [0], [1], [0, 0, 1, 1], [], []>} : vector<8x32xf32>, vector<32x32xf32>, vector<8x32xf32> -> vector<8x32xf32>
    %177 = arith.subf %176, %0 : vector<8x32xf32>
    %178 = arith.subf %175, %177 : vector<8x32xf32>
    %cst_65 = arith.constant 0.000000e+00 : f32
    %179 = vector.broadcast %cst_65 : f32 to vector<8x32xf32>
    %180 = arith.maximumf %178, %179 : vector<8x32xf32>
    %cst_66 = arith.constant dense<0.000000e+00> : vector<8x32xf32>
    %181 = tpu.matmul %180, %1, %cst_66 {dimension_numbers = #tpu.dot_dimension_numbers<[1], [0], [0], [1], [0, 0, 1, 1], [], []>} : vector<8x32xf32>, vector<32x32xf32>, vector<8x32xf32> -> vector<8x32xf32>
    %182 = arith.subf %181, %0 : vector<8x32xf32>
    %183 = arith.subf %180, %182 : vector<8x32xf32>
    %cst_67 = arith.constant 0.000000e+00 : f32
    %184 = vector.broadcast %cst_67 : f32 to vector<8x32xf32>
    %185 = arith.maximumf %183, %184 : vector<8x32xf32>
    %186 = arith.subf %185, %180 : vector<8x32xf32>
    %cst_68 = arith.constant 0.28175351 : f32
    %187 = vector.broadcast %cst_68 : f32 to vector<8x32xf32>
    %188 = arith.mulf %187, %186 : vector<8x32xf32>
    %189 = arith.addf %185, %188 : vector<8x32xf32>
    %cst_69 = arith.constant dense<0.000000e+00> : vector<8x32xf32>
    %190 = tpu.matmul %189, %1, %cst_69 {dimension_numbers = #tpu.dot_dimension_numbers<[1], [0], [0], [1], [0, 0, 1, 1], [], []>} : vector<8x32xf32>, vector<32x32xf32>, vector<8x32xf32> -> vector<8x32xf32>
    %191 = arith.subf %190, %0 : vector<8x32xf32>
    %192 = arith.subf %189, %191 : vector<8x32xf32>
    %cst_70 = arith.constant 0.000000e+00 : f32
    %193 = vector.broadcast %cst_70 : f32 to vector<8x32xf32>
    %194 = arith.maximumf %192, %193 : vector<8x32xf32>
    %195 = arith.subf %194, %185 : vector<8x32xf32>
    %cst_71 = arith.constant 0.434042782 : f32
    %196 = vector.broadcast %cst_71 : f32 to vector<8x32xf32>
    %197 = arith.mulf %196, %195 : vector<8x32xf32>
    %198 = arith.addf %194, %197 : vector<8x32xf32>
    %cst_72 = arith.constant dense<0.000000e+00> : vector<8x32xf32>
    %199 = tpu.matmul %198, %1, %cst_72 {dimension_numbers = #tpu.dot_dimension_numbers<[1], [0], [0], [1], [0, 0, 1, 1], [], []>} : vector<8x32xf32>, vector<32x32xf32>, vector<8x32xf32> -> vector<8x32xf32>
    %200 = arith.subf %199, %0 : vector<8x32xf32>
    %201 = arith.subf %198, %200 : vector<8x32xf32>
    %cst_73 = arith.constant 0.000000e+00 : f32
    %202 = vector.broadcast %cst_73 : f32 to vector<8x32xf32>
    %203 = arith.maximumf %201, %202 : vector<8x32xf32>
    %204 = arith.subf %203, %194 : vector<8x32xf32>
    %cst_74 = arith.constant 0.531063795 : f32
    %205 = vector.broadcast %cst_74 : f32 to vector<8x32xf32>
    %206 = arith.mulf %205, %204 : vector<8x32xf32>
    %207 = arith.addf %203, %206 : vector<8x32xf32>
    %cst_75 = arith.constant dense<0.000000e+00> : vector<8x32xf32>
    %208 = tpu.matmul %207, %1, %cst_75 {dimension_numbers = #tpu.dot_dimension_numbers<[1], [0], [0], [1], [0, 0, 1, 1], [], []>} : vector<8x32xf32>, vector<32x32xf32>, vector<8x32xf32> -> vector<8x32xf32>
    %209 = arith.subf %208, %0 : vector<8x32xf32>
    %210 = arith.subf %207, %209 : vector<8x32xf32>
    %cst_76 = arith.constant 0.000000e+00 : f32
    %211 = vector.broadcast %cst_76 : f32 to vector<8x32xf32>
    %212 = arith.maximumf %210, %211 : vector<8x32xf32>
    %c0_77 = arith.constant 0 : index
    %c0_78 = arith.constant 0 : index
    %213 = vector.load %arg6[%c0_77, %c0_78] : memref<8x32xf32, #tpu.memory_space<vmem>>, vector<8x32xf32>
    tpu.vector_store %arg6[%c0_77, %c0_78], %212 {strides = array<i32>} : memref<8x32xf32, #tpu.memory_space<vmem>>, vector<8x32xf32>,
    %cst_79 = arith.constant dense<0.000000e+00> : vector<8x16xf32>
    %214 = tpu.matmul %212, %2, %cst_79 {dimension_numbers = #tpu.dot_dimension_numbers<[1], [1], [0], [0], [0, 0, 1, 0], [], []>} : vector<8x32xf32>, vector<16x32xf32>, vector<8x16xf32> -> vector<8x16xf32>
    %c0_80 = arith.constant 0 : index
    %c0_81 = arith.constant 0 : index
    %215 = vector.load %arg5[%c0_80, %c0_81] : memref<8x16xf32, #tpu.memory_space<vmem>>, vector<8x16xf32>
    tpu.vector_store %arg5[%c0_80, %c0_81], %214 {strides = array<i32>} : memref<8x16xf32, #tpu.memory_space<vmem>>, vector<8x16xf32>,
    return
  }
  func.func @transform_0(%arg0: i32) -> (i32, i32) {
    %c0_i32 = arith.constant 0 : i32
    %c0_i32_0 = arith.constant 0 : i32
    return %arg0, %c0_i32 : i32, i32
  }
  func.func @transform_1(%arg0: i32) -> (i32, i32) {
    %c0_i32 = arith.constant 0 : i32
    %c0_i32_0 = arith.constant 0 : i32
    %c0_i32_1 = arith.constant 0 : i32
    return %c0_i32, %c0_i32_0 : i32, i32
  }
  func.func @transform_2(%arg0: i32) -> (i32, i32) {
    %c0_i32 = arith.constant 0 : i32
    %c0_i32_0 = arith.constant 0 : i32
    %c0_i32_1 = arith.constant 0 : i32
    return %c0_i32, %c0_i32_0 : i32, i32
  }
  func.func @transform_3(%arg0: i32) -> (i32, i32) {
    %c0_i32 = arith.constant 0 : i32
    %c0_i32_0 = arith.constant 0 : i32
    return %arg0, %c0_i32 : i32, i32
  }
  func.func @transform_4(%arg0: i32) -> (i32, i32) {
    %c0_i32 = arith.constant 0 : i32
    %c0_i32_0 = arith.constant 0 : i32
    return %arg0, %c0_i32 : i32, i32
  }
  func.func @transform_5(%arg0: i32) -> (i32, i32) {
    %c0_i32 = arith.constant 0 : i32
    %c0_i32_0 = arith.constant 0 : i32
    return %arg0, %c0_i32 : i32, i32
  }
}

</mosaic_0001>

<bundles_post_ra>
// kernel: custom-call.3
= control target key start
LH: loop header
LB: loop body
LE: loop exit
PB: predicated region body
PF: predicated region fallthrough
CT: control target
= control target key end

     0   :  { %11 = vsyncpa [#allocation9], 0  ;;  %s2893_s0 = inlined_call_operand.vmem [shape: f32[16,16], index: 0, kind: input, shape index: {}]   ;;  %s2894_s1 = inlined_call_operand.vmem [shape: f32[16,16], index: 1, kind: input, shape index: {}]   ;;  %s2895_s2 = inlined_call_operand.vmem [shape: f32[16,16], index: 2, kind: input, shape index: {}]   ;;  %s2896_s3 = inlined_call_operand.vmem [shape: f32[16,16], index: 3, kind: input, shape index: {}]   ;;  %s2897_s4 = inlined_call_operand.vmem [shape: f32[16], index: 4, kind: output, shape index: {0}]   ;;  %s2898_s5 = inlined_call_operand.vmem [shape: f32[16], index: 5, kind: output, shape index: {1}]   ;;  %s2899_s6 = inlined_call_operand.hbm [shape: f32[16,16], index: 6, kind: output, shape index: {2}]   ;;  %s2900_s7 = inlined_call_operand.hbm [shape: f32[16,16], index: 7, kind: output, shape index: {3}]   ;;  %s2901_s8 = inlined_call_operand.hbm [shape: f32[16,16], index: 8, kind: output, shape index: {4}]   ;;  %s2902_s9 = inlined_call_operand.hbm [shape: f32[16,16], index: 9, kind: output, shape index: {5}]  }
   0x1   :  { %12 = vsyncpa [#allocation11], 0 }
   0x2   :  { %13 = vsyncpa [#allocation14], 0  ;;  %s27_s11 = scalar_lea.vmem %s2893_s0, 8 }
   0x3   :  { %p1529_p0 = scmp.gt.s32.totalorder %s2893_s0, %s27_s11 }
   0x4   :  { %s2360_s14 = smov (!%p1529_p0), [#allocation0]   ;;  %s2364_s17 = smov (!%p1529_p0), %s2893_s0  }
   0x5   :  { %1530 = sbr.rel (%p1529_p0) target bundleno = 18 (0x12), region = 305 }
   0xa LB: > { %v61_v0 = vld [vmem:[%s2366_s17] sm:$0xff]  ;;  %s63_s17 = scalar_lea.vmem %s2366_s17, 8   ;;  %s2366_s17 = sphi %s2364_s17, %s63_s17   ;;  %s2362_s14 = sphi %s2360_s14, %s64_s14  }
   0xb   : > { %62 = vst [vmem:[%s2362_s14] sm:$0xff] %v61_v0  ;;  %s64_s14 = scalar_lea.vmem %s2362_s14, 8   ;;  %p58_p1 = scmp.gt.s32.totalorder %s63_s17, %s27_s11 }
   0xd   :  { %60 = sbr.rel (!%p58_p1) target bundleno = 10 (0xa), region = 311 }
  0x12 PF:  { %s90_s20 = scalar_lea.vmem %s2894_s1, 8 }
  0x13   :  { %p1549_p2 = scmp.gt.s32.totalorder %s2894_s1, %s90_s20 }
  0x14   :  { %s2368_s0 = smov (!%p1549_p2), [#allocation1]   ;;  %s2372_s25 = smov (!%p1549_p2), %s2894_s1  }
  0x15   :  { %1550 = sbr.rel (%p1549_p2) target bundleno = 34 (0x22), region = 327 }
  0x1a LB: > { %v124_v1 = vld [vmem:[%s2374_s25] sm:$0xff]  ;;  %s126_s25 = scalar_lea.vmem %s2374_s25, 8   ;;  %s2374_s25 = sphi %s2372_s25, %s126_s25   ;;  %s2370_s0 = sphi %s2368_s0, %s127_s0  }
  0x1b   : > { %125 = vst [vmem:[%s2370_s0] sm:$0xff] %v124_v1  ;;  %s127_s0 = scalar_lea.vmem %s2370_s0, 8   ;;  %p121_p3 = scmp.gt.s32.totalorder %s126_s25, %s90_s20 }
  0x1d   :  { %123 = sbr.rel (!%p121_p3) target bundleno = 26 (0x1a), region = 333 }
  0x22 PF:  { %s153_s28 = scalar_lea.vmem %s2895_s2, 8 }
  0x23   :  { %p1569_p4 = scmp.gt.s32.totalorder %s2895_s2, %s153_s28 }
  0x24   :  { %s2376_s1 = smov (!%p1569_p4), [#allocation2]   ;;  %s2380_s12 = smov (!%p1569_p4), %s2895_s2  }
  0x25   :  { %1570 = sbr.rel (%p1569_p4) target bundleno = 50 (0x32), region = 349 }
  0x2a LB: > { %v187_v2 = vld [vmem:[%s2382_s12] sm:$0xff]  ;;  %s189_s12 = scalar_lea.vmem %s2382_s12, 8   ;;  %s2382_s12 = sphi %s2380_s12, %s189_s12   ;;  %s2378_s1 = sphi %s2376_s1, %s190_s1  }
  0x2b   : > { %188 = vst [vmem:[%s2378_s1] sm:$0xff] %v187_v2  ;;  %s190_s1 = scalar_lea.vmem %s2378_s1, 8   ;;  %p184_p5 = scmp.gt.s32.totalorder %s189_s12, %s153_s28 }
  0x2d   :  { %186 = sbr.rel (!%p184_p5) target bundleno = 42 (0x2a), region = 355 }
  0x32 PF:  { %s216_s15 = scalar_lea.vmem %s2896_s3, 8 }
  0x33   :  { %p1589_p6 = scmp.gt.s32.totalorder %s2896_s3, %s216_s15 }
  0x34   :  { %s2384_s2 = smov (!%p1589_p6), [#allocation3]   ;;  %s2388_s20 = smov (!%p1589_p6), %s2896_s3  }
  0x35   :  { %1590 = sbr.rel (%p1589_p6) target bundleno = 66 (0x42), region = 371 }
  0x3a LB: > { %v250_v3 = vld [vmem:[%s2390_s20] sm:$0xff]  ;;  %s252_s20 = scalar_lea.vmem %s2390_s20, 8   ;;  %s2390_s20 = sphi %s2388_s20, %s252_s20   ;;  %s2386_s2 = sphi %s2384_s2, %s253_s2  }
  0x3b   : > { %251 = vst [vmem:[%s2386_s2] sm:$0xff] %v250_v3  ;;  %s253_s2 = scalar_lea.vmem %s2386_s2, 8   ;;  %p247_p7 = scmp.gt.s32.totalorder %s252_s20, %s216_s15 }
  0x3d   :  { %249 = sbr.rel (!%p247_p7) target bundleno = 58 (0x3a), region = 377 }
  0x42 PF:  { %s266_s21 = smov [#allocation15]  ;;  %v267_v4 = vld [vmem:[#allocation0] sm:$0xff]  ;;  %v271_v5 = vld [vmem:[#allocation0 + $0x8] sm:$0xff]  ;;  %s273_s22 = smov [#allocation16]  ;;  %v274_v6 = vld [vmem:[#allocation1] sm:$0xff]  ;;  %v307_v7 = vlaneseq  ;;  %v2400_v11 = vmov 0.0  }
  0x43   :  { %268 = vst [vmem:[%s266_s21] sm:$0xff] %v267_v4  ;;  %1774 = vst [vmem:[%s266_s21 + $0x8] sm:$0xff] %v271_v5  ;;  %v278_v8 = vld [vmem:[#allocation1 + $0x8] sm:$0xff]  ;;  %s280_s3 = smov [#allocation17]  ;;  %v281_v9 = vld [vmem:[#allocation2] sm:$0xff]  ;;  %s287_s0 = smov [#allocation18] }
  0x44   :  { %275 = vst [vmem:[%s273_s22] sm:$0xff] %v274_v6  ;;  %v285_v10 = vld [vmem:[#allocation2 + $0x8] sm:$0xff]  ;;  %294 = vst [vmem:[#allocation8] sm:$0xff] %v2400_v11  ;;  %v288_v12 = vld [vmem:[#allocation3] sm:$0xff]  ;;  %v2493_v14 = vand.u32 127, %v307_v7  ;;  %v2495_v15 = vshrl.u32 %v307_v7, 7  ;;  %s306_s23 = smov [#allocation8] }
  0x45   :  { %296 = vst [vmem:[#allocation8 + $0x8] sm:$0xff] %v2400_v11  ;;  %297 = vst [vmem:[#allocation10] sm:$0xff] %v2400_v11  ;;  %v292_v13 = vld [vmem:[#allocation3 + $0x8] sm:$0xff]  ;;  %s326_s24 = smov [#allocation13]  ;;  %s1607_s25 = smov [#allocation15] }
  0x46   :  { %299 = vst [vmem:[#allocation10 + $0x8] sm:$0xff] %v2400_v11  ;;  %300 = vst [vmem:[#allocation12] sm:$0xff] %v2400_v11  ;;  %v309_v14 = vmov %v2493_v14  ;;  %v312_v15 = vmov %v2495_v15  ;;  %vm1611_vm4 = vcmp.lt.s32.totalorder %v2493_v14, 16  ;;  %s1633_s26 = smov [#allocation16]  ;;  %s1656_s27 = smov [#allocation17] }
  0x47   :  { %302 = vst [vmem:[#allocation12 + $0x8] sm:$0xff] %v2400_v11  ;;  %303 = vst [vmem:[#allocation13] sm:$0xff] %v2400_v11  ;;  %v329_v14 = vmov %v2493_v14  ;;  %v332_v15 = vmov %v2495_v15  ;;  %v322_v16 = vadd.s32 8, %v312_v15  ;;  %vm316_vm0 = vcmp.eq.s32.totalorder %v312_v15, %v309_v14  ;;  %s1679_s28 = smov [#allocation18] }
  0x48   :  { %305 = vst [vmem:[#allocation13 + $0x8] sm:$0xff] %v2400_v11  ;;  %1775 = vst [vmem:[%s273_s22 + $0x8] sm:$0xff] %v278_v8  ;;  %v342_v17 = vadd.s32 8, %v332_v15  ;;  %vm336_vm1 = vcmp.eq.s32.totalorder %v332_v15, %v329_v14  ;;  %v1606_v15 = vmov %v2495_v15 }
  0x49   :  { %282 = vst [vmem:[%s280_s3] sm:$0xff] %v281_v9  ;;  %1776 = vst [vmem:[%s280_s3 + $0x8] sm:$0xff] %v285_v10  ;;  %vm323_vm2 = vcmp.eq.s32.totalorder %v322_v16, %v309_v14  ;;  %v1622_v34 = vadd.s32 8, %v1606_v15 }
  0x4a   :  { %289 = vst [vmem:[%s287_s0] sm:$0xff] %v288_v12  ;;  %1777 = vst [vmem:[%s287_s0 + $0x8] sm:$0xff] %v292_v13  ;;  %vm343_vm3 = vcmp.eq.s32.totalorder %v342_v17, %v329_v14  ;;  %v1603_v14 = vmov %v2493_v14  ;;  %v1613_v26 = vld [vmem:[%s1607_s25] sm:$0xff]  ;;  %v1782_v27 = vld [vmem:[%s1607_s25 + $0x8] sm:$0xff] }
  0x4b   :  { %vm1616_vm5 = vcmp.eq.s32.totalorder %v1606_v15, %v1603_v14  ;;  %v1629_v14 = vmov %v2493_v14  ;;  %v1614_v29 = vsel %vm1611_vm4, %v1613_v26, 0.0  ;;  %v1620_v30 = vsel %vm1611_vm4, %v1782_v27, 0.0 }
  0x4c   :  { %v313_v18 = vld [vmem:[%s306_s23] sm:$0xff]  ;;  %v1778_v19 = vld [vmem:[%s306_s23 + $0x8] sm:$0xff]  ;;  %v1615_v35 = vmul.f32 %v1614_v29, %v1614_v29  ;;  %v1621_v36 = vmul.f32 %v1620_v30, %v1620_v30  ;;  %vm1623_vm6 = vcmp.eq.s32.totalorder %v1622_v34, %v1603_v14  ;;  %v1678_v15 = vmov %v2495_v15 }
  0x4d   :  { %v317_v21 = vsel %vm316_vm0, 1.0, %v313_v18  ;;  %v324_v22 = vsel %vm323_vm2, 1.0, %v1778_v19  ;;  %v1632_v15 = vmov %v2495_v15  ;;  %v1652_v14 = vmov %v2493_v14 }
  0x4e   :  { %318 = vst [vmem:[%s306_s23] sm:$0xff] %v317_v21  ;;  %1779 = vst [vmem:[%s306_s23 + $0x8] sm:$0xff] %v324_v22  ;;  %v1626_v41 = vadd.f32 %v1621_v36, %v1615_v35  ;;  %v1617_v45 = vsel %vm1616_vm5, 0.0, %v1615_v35  ;;  %v1624_v49 = vsel %vm1623_vm6, 0.0, %v1621_v36  ;;  %v1675_v14 = vmov %v2493_v14 }
  0x4f   :  { %v333_v20 = vld [vmem:[%s326_s24] sm:$0xff]  ;;  %v1780_v24 = vld [vmem:[%s326_s24 + $0x8] sm:$0xff]  ;;  %v1625_v51 = vadd.f32 %v1624_v49, %v1617_v45  ;;  %v1655_v15 = vmov %v2495_v15  ;;  %v1696_v56 = vadd.s32 8, %v1678_v15  ;;  %vm1688_vm7 = vcmp.eq.s32.totalorder %v1678_v15, %v1675_v14 }
  0x50   :  { %v337_v23 = vsel %vm336_vm1, 1.0, %v333_v20  ;;  %v344_v25 = vsel %vm343_vm3, 1.0, %v1780_v24  ;;  %v1639_v28 = vld [vmem:[%s1633_s26] sm:$0xff]  ;;  %v1783_v32 = vld [vmem:[%s1633_s26 + $0x8] sm:$0xff] }
  0x51   :  { %338 = vst [vmem:[%s326_s24] sm:$0xff] %v337_v23  ;;  %1781 = vst [vmem:[%s326_s24 + $0x8] sm:$0xff] %v344_v25  ;;  %v1640_v31 = vsel %vm1611_vm4, %v1639_v28, 0.0  ;;  %v1662_v33 = vld [vmem:[%s1656_s27] sm:$0xff]  ;;  %v1646_v38 = vsel %vm1611_vm4, %v1783_v32, 0.0  ;;  %v1784_v39 = vld [vmem:[%s1656_s27 + $0x8] sm:$0xff]  ;;  %vm1697_vm8 = vcmp.eq.s32.totalorder %v1696_v56, %v1675_v14 }
  0x52   :  { %v1641_v37 = vmul.f32 %v1640_v31, %v1640_v31  ;;  %v1663_v40 = vsel %vm1611_vm4, %v1662_v33, 0.0  ;;  %v1647_v42 = vmul.f32 %v1646_v38, %v1646_v38  ;;  %v1685_v43 = vld [vmem:[%s1679_s28] sm:$0xff]  ;;  %v1669_v44 = vsel %vm1611_vm4, %v1784_v39, 0.0  ;;  %v1785_v48 = vld [vmem:[%s1679_s28 + $0x8] sm:$0xff] }
  0x53   :  { %v1664_v47 = vmul.f32 %v1663_v40, %v1663_v40  ;;  %v1686_v50 = vsel %vm1611_vm4, %v1685_v43, 0.0  ;;  %v1670_v53 = vmul.f32 %v1669_v44, %v1669_v44  ;;  %v1694_v54 = vsel %vm1611_vm4, %v1785_v48, 0.0 }
  0x54   :  { %v1643_v46 = vadd.f32 %v1641_v37, %v1626_v41  ;;  %v1642_v55 = vadd.f32 %v1641_v37, %v1625_v51  ;;  %v1687_v58 = vmul.f32 %v1686_v50, %v1686_v50  ;;  %v1695_v61 = vmul.f32 %v1694_v54, %v1694_v54 }
  0x56   :  { %v1649_v52 = vadd.f32 %v1647_v42, %v1643_v46  ;;  %v1648_v59 = vadd.f32 %v1647_v42, %v1642_v55  ;;  %v1689_v0 = vsel %vm1688_vm7, 0.0, %v1687_v58  ;;  %v1698_v3 = vsel %vm1697_vm8, 0.0, %v1695_v61 }
  0x58   :  { %v1666_v57 = vadd.f32 %v1664_v47, %v1649_v52  ;;  %v1665_v62 = vadd.f32 %v1664_v47, %v1648_v59 }
  0x5a   :  { %v1672_v60 = vadd.f32 %v1670_v53, %v1666_v57  ;;  %v1671_v1 = vadd.f32 %v1670_v53, %v1665_v62 }
  0x5c   :  { %v1691_v63 = vadd.f32 %v1687_v58, %v1672_v60  ;;  %v1690_v4 = vadd.f32 %v1689_v0, %v1671_v1 }
  0x5e   :  { %v1700_v2 = vadd.f32 %v1695_v61, %v1691_v63  ;;  %v1699_v5 = vadd.f32 %v1698_v3, %v1690_v4 }
  0x60   :  { %1701 = vadd.xlane.f32.xlu0 %v1700_v2 }
  0x64   :  { %1709 = vadd.xlane.f32.xlu0 %v1699_v5 }
  0xe9   :  { %v1702_v6 = vpop.xlane.xlu0 %1701 }
  0xea   :  { %v1703_v7 = vrot.slane %v1702_v6, 4 }
  0xec   :  { %v1704_v8 = vadd.f32 %v1703_v7, %v1702_v6 }
  0xed   :  { %v1710_v9 = vpop.xlane.xlu0 %1709 }
  0xee   :  { %v1705_v10 = vrot.slane %v1704_v8, 2  ;;  %v1711_v11 = vrot.slane %v1710_v9, 4 }
  0xf0   :  { %v1712_v12 = vadd.f32 %v1711_v11, %v1710_v9  ;;  %v1706_v13 = vadd.f32 %v1705_v10, %v1704_v8 }
  0xf2   :  { %v1713_v16 = vrot.slane %v1712_v12, 2  ;;  %v1707_v18 = vrot.slane %v1706_v13, 1 }
  0xf4   :  { %v1714_v17 = vadd.f32 %v1713_v16, %v1712_v12  ;;  %v1708_v21 = vadd.f32 %v1707_v18, %v1706_v13 }
  0xf6   :  { %v1715_v19 = vrot.slane %v1714_v17, 1 }
  0xf8   :  { %v1716_v20 = vadd.f32 %v1715_v19, %v1714_v17 }
  0xfa   :  { %1891 = vpush %v1716_v20 }
  0xfb   :  { %1893 = vpush %v1708_v21 }
 0x12b   :  { %s1892_s29 = spop %1891 }
 0x12c   :  { %s1894_s30 = spop %1893 }
 0x12d   :  { %s1719_s1 = smul.f32 1e-10, %s1894_s30 }
 0x12f   :  { %p1720_p8 = scmp.le.f32.partialorder %s1892_s29, %s1719_s1 }
 0x130   :  { %s2527_s10 = smov (!%p1720_p8), 0  }
 0x131   :  { %1723 = sbr.rel (%p1720_p8) target bundleno = 1032 (0x408), region = 393 }
 0x136 LB: > { %s2532_s11 = smov 0   ;;  %s2394_s10 = sphi %s2527_s10, %s2903_s10  }
 0x137 LB: >> { %s482_s12 = smov [#allocation15]  ;;  %v486_v14 = vmov %v2493_v14  ;;  %v489_v15 = vmov %v2495_v15  ;;  %s508_s13 = smov [#allocation16]  ;;  %vm1015_vm8 = vcmp.eq.s32.totalorder %v2495_v15, 0  ;;  %s2398_s11 = sphi %s2532_s11, %s481_s11  }
 0x138   : >> { %v512_v14 = vmov %v2493_v14  ;;  %v515_v15 = vmov %v2495_v15  ;;  %v490_v22 = vld [vmem:[%s482_s12] sm:$0xff]  ;;  %vm493_vm9 = vcmp.eq.s32.totalorder %v489_v15, %v486_v14  ;;  %v1786_v23 = vld [vmem:[%s482_s12 + $0x8] sm:$0xff]  ;;  %v498_v24 = vadd.s32 8, %v489_v15  ;;  %s534_s14 = smov [#allocation18]  ;;  %s483_s15 = smov [#allocation19] }
 0x139   : >> { %vm519_vm10 = vcmp.eq.s32.totalorder %v515_v15, %v512_v14  ;;  %v524_v25 = vadd.s32 8, %v515_v15  ;;  %v494_v26 = vsel %vm493_vm9, %v490_v22, 0.0  ;;  %v516_v27 = vld [vmem:[%s508_s13] sm:$0xff]  ;;  %v1787_v28 = vld [vmem:[%s508_s13 + $0x8] sm:$0xff]  ;;  %v538_v14 = vmov %v2493_v14  ;;  %s509_s16 = smov [#allocation20]  ;;  %s535_s17 = smov [#allocation21] }
 0x13a   : >> { %v541_v15 = vmov %v2495_v15  ;;  %vm499_vm11 = vcmp.eq.s32.totalorder %v498_v24, %v486_v14  ;;  %v520_v29 = vsel %vm519_vm10, %v516_v27, 0.0  ;;  %v542_v30 = vld [vmem:[%s534_s14] sm:$0xff]  ;;  %v1788_v34 = vld [vmem:[%s534_s14 + $0x8] sm:$0xff]  ;;  %s564_s2 = smov [#allocation20]  ;;  %s562_s18 = smov [#allocation19]  ;;  %vm1039_vm9 = vcmp.eq.s32.totalorder %v2495_v15, 7 }
 0x13b   : >> { %vm525_vm12 = vcmp.eq.s32.totalorder %v524_v25, %v512_v14  ;;  %vm545_vm13 = vcmp.eq.s32.totalorder %v541_v15, %v538_v14  ;;  %v500_v31 = vsel %vm499_vm11, %v1786_v23, %v494_v26  ;;  %v550_v35 = vadd.s32 8, %v541_v15  ;;  %s566_s19 = smov [#allocation21]  ;;  %s601_s20 = smov [#allocation22] }
 0x13c   : >> { %v526_v32 = vsel %vm525_vm12, %v1787_v28, %v520_v29  ;;  %v546_v33 = vsel %vm545_vm13, %v542_v30, 0.0  ;;  %v501_v36 = vrot.slane %v500_v31, 4  ;;  %s603_s21 = smov [#allocation23]  ;;  %s560_s22 = smov [#allocation24]  ;;  %v631_v15 = vmov %v2495_v15 }
 0x13d   : >> { %v527_v37 = vrot.slane %v526_v32, 4  ;;  %vm551_vm14 = vcmp.eq.s32.totalorder %v550_v35, %v538_v14  ;;  %s561_s3 = smov [#allocation25]  ;;  %s605_s22 = smov %s560_s22  ;;  %v662_v15 = vmov %v2495_v15  ;;  %v632_v24 = vadd.s32 8, %v631_v15 }
 0x13e   : >> { %v502_v38 = vadd.f32 %v501_v36, %v500_v31  ;;  %v552_v40 = vsel %vm551_vm14, %v1788_v34, %v546_v33  ;;  %s607_s3 = smov %s561_s3  ;;  %v613_v14 = vmov %v2493_v14  ;;  %v616_v15 = vmov %v2495_v15  ;;  %s609_s0 = smov [#allocation24] }
 0x13f   : >> { %v528_v39 = vadd.f32 %v527_v37, %v526_v32  ;;  %v553_v41 = vrot.slane %v552_v40, 4  ;;  %v628_v14 = vmov %v2493_v14  ;;  %v663_v25 = vadd.s32 8, %v662_v15  ;;  %s624_s23 = smov [#allocation24]  ;;  %s640_s24 = smov [#allocation25] }
 0x140   : >> { %v503_v42 = vrot.slane %v502_v38, 2  ;;  %v644_v14 = vmov %v2493_v14  ;;  %v647_v15 = vmov %v2495_v15  ;;  %vm618_vm3 = vcmp.eq.s32.totalorder %v616_v15, %v613_v14  ;;  %s655_s25 = smov [#allocation25]  ;;  %s622_s26 = smov [#allocation26] }
 0x141   : >> { %v529_v43 = vrot.slane %v528_v39, 2  ;;  %v554_v44 = vadd.f32 %v553_v41, %v552_v40  ;;  %v659_v14 = vmov %v2493_v14  ;;  %vm633_vm5 = vcmp.eq.s32.totalorder %v632_v24, %v628_v14  ;;  %s637_s27 = smov [#allocation26]  ;;  %s671_s28 = smov [#allocation26] }
 0x142   : >> { %v504_v45 = vadd.f32 %v503_v42, %v502_v38  ;;  %vm649_vm6 = vcmp.eq.s32.totalorder %v647_v15, %v644_v14  ;;  %vm664_vm7 = vcmp.eq.s32.totalorder %v663_v25, %v659_v14  ;;  %s653_s29 = smov [#allocation27]  ;;  %s2551_s30 = smov [#allocation15]  ;;  %v818_v15 = vmov %v2495_v15 }
 0x143   : >> { %v530_v46 = vadd.f32 %v529_v43, %v528_v39  ;;  %v555_v47 = vrot.slane %v554_v44, 2  ;;  %s668_s1 = smov [#allocation27]  ;;  %s2553_s12 = smov [#allocation16]  ;;  %v679_v38 = vld [vmem:[%s2551_s30] sm:$0xff]  ;;  %v796_v15 = vmov %v2495_v15  ;;  %v815_v14 = vmov %v2493_v14 }
 0x144   : >> { %v505_v48 = vrot.slane %v504_v45, 1  ;;  %s2555_s13 = smov [#allocation17]  ;;  %s2557_s14 = smov [#allocation18]  ;;  %v680_v39 = vld [vmem:[%s2553_s12] sm:$0xff]  ;;  %v838_v15 = vmov %v2495_v15  ;;  %v793_v14 = vmov %v2493_v14  ;;  %vm822_vm10 = vcmp.eq.s32.totalorder %v818_v15, %v815_v14 }
 0x145   : >> { %v531_v49 = vrot.slane %v530_v46, 1  ;;  %v556_v50 = vadd.f32 %v555_v47, %v554_v44  ;;  %v681_v40 = vld [vmem:[%s2555_s13] sm:$0xff]  ;;  %v859_v15 = vmov %v2495_v15  ;;  %v835_v14 = vmov %v2493_v14  ;;  %s481_s11 = sadd.s32 1, %s2398_s11  }
 0x146   : >> { %v506_v51 = vadd.f32 %v505_v48, %v504_v45  ;;  %v682_v41 = vld [vmem:[%s2557_s14] sm:$0xff]  ;;  %v856_v14 = vmov %v2493_v14  ;;  %vm801_vm12 = vcmp.eq.s32.totalorder %v796_v15, %v793_v14  ;;  %vm842_vm14 = vcmp.eq.s32.totalorder %v838_v15, %v835_v14  ;;  %p478_p9 = scmp.ge.s32.totalorder %s481_s11, 31  }
 0x147   : >> { %v532_v52 = vadd.f32 %v531_v49, %v530_v46  ;;  %v557_v53 = vrot.slane %v556_v50, 1  ;;  %s429_s11 = smov (%p478_p9), [#allocation18] }
 0x148   : >> { %507 = vst [vmem:[%s483_s15] sm:$0x1] %v506_v51  ;;  %s1095_s15 = smov [#allocation26] }
 0x149   : >> { %533 = vst [vmem:[%s509_s16] sm:$0x1] %v532_v52  ;;  %v558_v54 = vadd.f32 %v557_v53, %v556_v50  ;;  %s2559_s16 = smov [#allocation8] }
 0x14a   : >> { %v1103_v42 = vld [vmem:[%s2559_s16] sm:$0xff] }
 0x14b   : >> { %559 = vst [vmem:[%s535_s17] sm:$0x1] %v558_v54  ;;  %s2561_s17 = smov [#allocation10] }
 0x14c   : >> { %v1104_v43 = vld [vmem:[%s2561_s17] sm:$0xff] }
 0x14f   : >> { %v563_v57 = vld [vmem:[%s562_s18] sm:$0xff]  ;;  %s2566_s18 = smov [#allocation13] }
 0x150   : >> { %v565_v55 = vld [vmem:[%s564_s2] sm:$0xff]  ;;  %v586_v8 = vand.u32 2147483647, %v563_v57  ;;  %s2564_s2 = smov [#allocation12] }
 0x151   : >> { %v569_v56 = vmul.f32 2.0, %v565_v55  ;;  %v587_v11 = vand.u32 2147483647, %v565_v55  ;;  %v1105_v45 = vld [vmem:[%s2564_s2] sm:$0xff] }
 0x152   : >> { %v567_v58 = vld [vmem:[%s566_s19] sm:$0xff]  ;;  %s673_s19 = smov [#allocation27] }
 0x153   : >> { %2146 = vrcp.f32 %v569_v56  ;;  %v568_v59 = vsub.f32 %v567_v58, %v563_v57  ;;  %v588_v9 = vand.u32 2147483647, %v567_v58  ;;  %v1106_v46 = vld [vmem:[%s2566_s18] sm:$0xff] }
 0x155   : >> { %v589_v10 = vmin.f32 %v586_v8, %v588_v9 }
 0x157   : >> { %v590_v12 = vmul.f32 1.1920929e-08, %v589_v10 }
 0x159   : >> { %vm591_vm2 = vcmp.le.f32.partialorder %v587_v11, %v590_v12 }
 0x160   : >> { %v2147_v60 = vpop.eup %2146 }
 0x161   : >> { %v571_v61 = vmul.f32 %v2147_v60, %v568_v59 }
 0x163   : >> { %v573_v62 = vmul.f32 %v571_v61, %v571_v61  ;;  %vm572_vm1 = vcmp.ge.f32.partialorder %v571_v61, 0.0 }
 0x165   : >> { %v574_v63 = vadd.f32 1.0, %v573_v62 }
 0x167   : >> { %2148 = vrsqrt.f32 %v574_v63  ;;  %vm577_vm15 = vcmp.eq.f32.partialorder %v574_v63, inf  ;;  %v580_v1 = vand.u32 2147483648, %v574_v63  ;;  %vm579_vm0 = vcmp.eq.f32.partialorder %v574_v63, 0.0 }
 0x174   : >> { %v2149_v0 = vpop.eup %2148 }
 0x175   : >> { %v576_v2 = vmul.f32 %v2149_v0, %v574_v63 }
 0x177   : >> { %v578_v3 = vsel %vm577_vm15, %v574_v63, %v576_v2 }
 0x178   : >> { %v581_v4 = vsel %vm579_vm0, %v580_v1, %v578_v3  ;;  %vm864_vm0 = vcmp.eq.s32.totalorder %v859_v15, %v856_v14 }
 0x179   : >> { %v582_v5 = vxor.u32 2147483648, %v581_v4 }
 0x17b   : >> { %v583_v6 = vsel %vm572_vm1, %v581_v4, %v582_v5 }
 0x17c   : >> { %v584_v7 = vadd.f32 %v583_v6, %v571_v61 }
 0x17e   : >> { %2150 = vrcp.f32 %v584_v7 }
 0x18b   : >> { %v2151_v13 = vpop.eup %2150 }
 0x18c   : >> { %v592_v16 = vsel %vm591_vm2, 0.0, %v2151_v13  ;;  %vm886_vm2 = vcmp.eq.s32.totalorder %v2493_v14, 0 }
 0x18d   : >> { %v593_v17 = vmul.f32 %v592_v16, %v592_v16  ;;  %v597_v18 = vmul.f32 %v592_v16, %v565_v55 }
 0x18f   : >> { %v594_v19 = vadd.f32 1.0, %v593_v17  ;;  %v598_v20 = vsub.f32 %v563_v57, %v597_v18  ;;  %v600_v21 = vadd.f32 %v597_v18, %v567_v58 }
 0x191   : >> { %2152 = vrsqrt.f32 %v594_v19  ;;  %602 = vst [vmem:[%s601_s20] sm:$0xff] %v598_v20  ;;  %604 = vst [vmem:[%s603_s21] sm:$0xff] %v600_v21  ;;  %s1097_s20 = smov [#allocation27]  ;;  %s699_s21 = smov [#allocation26] }
 0x19e   : >> { %v2153_v22 = vpop.eup %2152 }
 0x19f   : >> { %606 = vst [vmem:[%s605_s22] sm:$0xff] %v2153_v22  ;;  %v596_v23 = vmul.f32 %v2153_v22, %v592_v16  ;;  %s1123_s22 = smov [#allocation26] }
 0x1a1   : >> { %608 = vst [vmem:[%s607_s3] sm:$0xff] %v596_v23  ;;  %s702_s3 = smov [#allocation27] }
 0x1a6   : >> { %v610_v26 = vld [vmem:[%s609_s0] ss:$0 sm:$0xff]  ;;  %s2583_s0 = smov [#allocation15] }
 0x1a7   : >> { %v625_v27 = vld [vmem:[%s624_s23] ss:$0 sm:$0xff]  ;;  %v619_v28 = vsel %vm618_vm3, %v610_v26, 0.0  ;;  %s2585_s23 = smov [#allocation17]  ;;  %vm890_vm3 = vcmp.eq.s32.totalorder %v2493_v14, 1 }
 0x1a8   : >> { %v634_v29 = vsel %vm633_vm5, %v625_v27, 0.0  ;;  %620 = vadd.xlane.f32.xlu0 %v619_v28  ;;  %v641_v30 = vld [vmem:[%s640_s24] ss:$0 sm:$0xff]  ;;  %s1126_s24 = smov [#allocation27]  ;;  %vm903_vm5 = vcmp.eq.s32.totalorder %v2493_v14, 15 }
 0x1a9   : >> { %635 = vadd.xlane.f32.xlu1 %v634_v29  ;;  %v656_v31 = vld [vmem:[%s655_s25] ss:$0 sm:$0xff]  ;;  %v650_v32 = vsel %vm649_vm6, %v641_v30, 0.0  ;;  %s2587_s25 = smov [#allocation18] }
 0x1aa   : >> { %v665_v33 = vsel %vm664_vm7, %v656_v31, 0.0 }
 0x1ac   : >> { %651 = vadd.xlane.f32.xlu0 %v650_v32 }
 0x1ad   : >> { %666 = vadd.xlane.f32.xlu1 %v665_v33 }
 0x231   : >> { %v621_v34 = vpop.xlane.xlu0 %620 }
 0x232   : >> { %v636_v35 = vpop.xlane.xlu1 %635  ;;  %623 = vst [vmem:[%s622_s26] sm:$0xff] %v621_v34  ;;  %s2589_s26 = smov [#allocation8] }
 0x233   : >> { %1789 = vst [vmem:[%s637_s27 + $0x8] sm:$0xff] %v636_v35  ;;  %s2591_s27 = smov [#allocation10] }
 0x235   : >> { %v652_v36 = vpop.xlane.xlu0 %651 }
 0x236   : >> { %v667_v37 = vpop.xlane.xlu1 %666  ;;  %654 = vst [vmem:[%s653_s29] sm:$0xff] %v652_v36  ;;  %s2595_s29 = smov [#allocation13] }
 0x237   : >> { %1790 = vst [vmem:[%s668_s1 + $0x8] sm:$0xff] %v667_v37  ;;  %s2611_s1 = smov [#allocation8] }
 0x23a   : >> { %v672_v44 = vld [vmem:[%s671_s28] sm:$0xff]  ;;  %v1791_v10 = vld [vmem:[%s699_s21 + $0x8] sm:$0xff]  ;;  %s2593_s28 = smov [#allocation12]  ;;  %s763_s21 = smov [#allocation16] }
 0x23b   : >> { %v1096_v47 = vld [vmem:[%s1095_s15] sm:$0xff]  ;;  %v683_v48 = vmul.f32 %v679_v38, %v672_v44  ;;  %v686_v49 = vmul.f32 %v680_v39, %v672_v44  ;;  %v690_v50 = vmul.f32 %v681_v40, %v672_v44  ;;  %v693_v51 = vmul.f32 %v682_v41, %v672_v44  ;;  %v1849_v11 = vld [vmem:[%s1123_s22 + $0x8] sm:$0xff]  ;;  %s735_s15 = smov [#allocation25]  ;;  %s765_s22 = smov [#allocation17] }
 0x23c   : >> { %v1107_v52 = vmul.f32 %v1103_v42, %v1096_v47  ;;  %v1110_v53 = vmul.f32 %v1104_v43, %v1096_v47  ;;  %v1114_v54 = vmul.f32 %v1105_v45, %v1096_v47  ;;  %v1117_v55 = vmul.f32 %v1106_v46, %v1096_v47 }
 0x23e   : >> { %v674_v56 = vld [vmem:[%s673_s19] sm:$0xff]  ;;  %v1792_v12 = vld [vmem:[%s702_s3 + $0x8] sm:$0xff]  ;;  %s2631_s19 = smov [#allocation18]  ;;  %s767_s3 = smov [#allocation18] }
 0x23f   : >> { %v1098_v57 = vld [vmem:[%s1097_s20] sm:$0xff]  ;;  %v684_v58 = vmul.f32 %v681_v40, %v674_v56  ;;  %v687_v59 = vmul.f32 %v682_v41, %v674_v56  ;;  %v689_v60 = vmul.f32 %v679_v38, %v674_v56  ;;  %v692_v61 = vmul.f32 %v680_v39, %v674_v56  ;;  %v1850_v13 = vld [vmem:[%s1126_s24 + $0x8] sm:$0xff]  ;;  %s761_s20 = smov [#allocation15]  ;;  %s812_s24 = smov [#allocation16] }
 0x240   : >> { %v1108_v62 = vmul.f32 %v1105_v45, %v1098_v57  ;;  %v1111_v63 = vmul.f32 %v1106_v46, %v1098_v57  ;;  %v1113_v0 = vmul.f32 %v1103_v42, %v1098_v57  ;;  %v1116_v1 = vmul.f32 %v1104_v43, %v1098_v57 }
 0x241   : >> { %v685_v2 = vsub.f32 %v683_v48, %v684_v58  ;;  %v688_v3 = vsub.f32 %v686_v49, %v687_v59  ;;  %v691_v4 = vadd.f32 %v690_v50, %v689_v60  ;;  %v694_v5 = vadd.f32 %v693_v51, %v692_v61 }
 0x242   : >> { %v1109_v6 = vsub.f32 %v1107_v52, %v1108_v62  ;;  %v1112_v7 = vsub.f32 %v1110_v53, %v1111_v63  ;;  %v1115_v8 = vadd.f32 %v1114_v54, %v1113_v0  ;;  %v1118_v9 = vadd.f32 %v1117_v55, %v1116_v1  ;;  %v2638_v52 = vld [vmem:[%s735_s15] ss:$0 sm:$0xff]  ;;  %s2739_s15 = smov [#allocation16] }
 0x243   : >> { %695 = vst [vmem:[%s2551_s30] sm:$0xff] %v685_v2  ;;  %697 = vst [vmem:[%s2555_s13] sm:$0xff] %v691_v4  ;;  %s2597_s30 = smov [#allocation16]  ;;  %s2616_s13 = smov [#allocation10] }
 0x244   : >> { %698 = vst [vmem:[%s2557_s14] sm:$0xff] %v694_v5  ;;  %696 = vst [vmem:[%s2553_s12] sm:$0xff] %v688_v3  ;;  %s2613_s12 = smov [#allocation12]  ;;  %s733_s14 = smov [#allocation24] }
 0x245   : >> { %1119 = vst [vmem:[%s2559_s16] sm:$0xff] %v1109_v6  ;;  %1120 = vst [vmem:[%s2561_s17] sm:$0xff] %v1112_v7  ;;  %s2621_s16 = smov [#allocation15]  ;;  %s2624_s17 = smov [#allocation13]  ;;  %v2636_v51 = vld [vmem:[%s733_s14] ss:$0 sm:$0xff] }
 0x246   : >> { %1121 = vst [vmem:[%s2564_s2] sm:$0xff] %v1115_v8  ;;  %1122 = vst [vmem:[%s2566_s18] sm:$0xff] %v1118_v9  ;;  %s2626_s2 = smov [#allocation16]  ;;  %s2629_s18 = smov [#allocation17] }
 0x247   : >> { %s2735_s14 = smov [#allocation18] }
 0x24a   : >> { %v1793_v16 = vld [vmem:[%s2583_s0 + $0x8] sm:$0xff] }
 0x24b   : >> { %v1795_v17 = vld [vmem:[%s2585_s23 + $0x8] sm:$0xff]  ;;  %v717_v19 = vmul.f32 %v1793_v16, %v1791_v10  ;;  %v723_v22 = vmul.f32 %v1793_v16, %v1792_v12 }
 0x24c   : >> { %v1796_v18 = vld [vmem:[%s2587_s25 + $0x8] sm:$0xff]  ;;  %v718_v20 = vmul.f32 %v1795_v17, %v1792_v12  ;;  %v724_v26 = vmul.f32 %v1795_v17, %v1791_v10 }
 0x24d   : >> { %v721_v21 = vmul.f32 %v1796_v18, %v1792_v12  ;;  %v1851_v23 = vld [vmem:[%s2589_s26 + $0x8] sm:$0xff]  ;;  %v727_v27 = vmul.f32 %v1796_v18, %v1791_v10 }
 0x24e   : >> { %v1852_v24 = vld [vmem:[%s2591_s27 + $0x8] sm:$0xff]  ;;  %v1141_v29 = vmul.f32 %v1851_v23, %v1849_v11  ;;  %v719_v32 = vsub.f32 %v717_v19, %v718_v20  ;;  %v1147_v35 = vmul.f32 %v1851_v23, %v1850_v13  ;;  %v725_v36 = vadd.f32 %v724_v26, %v723_v22 }
 0x24f   : >> { %v1853_v25 = vld [vmem:[%s2593_s28 + $0x8] sm:$0xff]  ;;  %v1144_v33 = vmul.f32 %v1852_v24, %v1849_v11  ;;  %v1150_v39 = vmul.f32 %v1852_v24, %v1850_v13 }
 0x250   : >> { %v1854_v28 = vld [vmem:[%s2595_s29 + $0x8] sm:$0xff]  ;;  %v1142_v30 = vmul.f32 %v1853_v25, %v1850_v13  ;;  %v1148_v38 = vmul.f32 %v1853_v25, %v1849_v11  ;;  %1797 = vst [vmem:[%s2583_s0 + $0x8] sm:$0xff] %v719_v32  ;;  %1799 = vst [vmem:[%s2585_s23 + $0x8] sm:$0xff] %v725_v36  ;;  %s790_s0 = smov [#allocation22]  ;;  %s853_s23 = smov [#allocation23] }
 0x251   : >> { %v1794_v31 = vld [vmem:[%s2597_s30 + $0x8] sm:$0xff]  ;;  %v1145_v34 = vmul.f32 %v1854_v28, %v1850_v13  ;;  %v1151_v41 = vmul.f32 %v1854_v28, %v1849_v11 }
 0x252   : >> { %v1143_v37 = vsub.f32 %v1141_v29, %v1142_v30  ;;  %v720_v42 = vmul.f32 %v1794_v31, %v1791_v10  ;;  %v726_v43 = vmul.f32 %v1794_v31, %v1792_v12  ;;  %v1149_v44 = vadd.f32 %v1148_v38, %v1147_v35 }
 0x253   : >> { %v1146_v40 = vsub.f32 %v1144_v33, %v1145_v34  ;;  %v1152_v45 = vadd.f32 %v1151_v41, %v1150_v39 }
 0x254   : >> { %1855 = vst [vmem:[%s2589_s26 + $0x8] sm:$0xff] %v1143_v37  ;;  %v722_v46 = vsub.f32 %v720_v42, %v721_v21  ;;  %v728_v47 = vadd.f32 %v727_v27, %v726_v43  ;;  %1857 = vst [vmem:[%s2593_s28 + $0x8] sm:$0xff] %v1149_v44  ;;  %s832_s26 = smov [#allocation17]  ;;  %s2724_s28 = smov [#allocation16] }
 0x255   : >> { %1856 = vst [vmem:[%s2591_s27 + $0x8] sm:$0xff] %v1146_v40  ;;  %1858 = vst [vmem:[%s2595_s29 + $0x8] sm:$0xff] %v1152_v45  ;;  %s852_s27 = smov [#allocation18]  ;;  %s2726_s29 = smov [#allocation15] }
 0x256   : >> { %1798 = vst [vmem:[%s2597_s30 + $0x8] sm:$0xff] %v722_v46  ;;  %1800 = vst [vmem:[%s2587_s25 + $0x8] sm:$0xff] %v728_v47  ;;  %v828_v46 = vadd.s32 8, %v818_v15  ;;  %v808_v47 = vadd.s32 8, %v796_v15  ;;  %s2712_s25 = smov [#allocation15]  ;;  %s2401_s30 = smov 1  }
 0x257   : >> { %v741_v53 = vld [vmem:[%s2621_s16] sm:$0xff] }
 0x258   : >> { %v745_v11 = vmul.f32 %v741_v53, %v2636_v51  ;;  %v748_v12 = vmul.f32 %v741_v53, %v2638_v52  ;;  %v743_v18 = vld [vmem:[%s2629_s18] sm:$0xff]  ;;  %vm829_vm11 = vcmp.eq.s32.totalorder %v828_v46, %v815_v14  ;;  %vm809_vm13 = vcmp.eq.s32.totalorder %v808_v47, %v793_v14 }
 0x259   : >> { %v751_v22 = vmul.f32 %v743_v18, %v2636_v51  ;;  %v754_v24 = vmul.f32 %v743_v18, %v2638_v52 }
 0x25b   : >> { %v1159_v48 = vld [vmem:[%s2611_s1] ss:$0 sm:$0xff]  ;;  %v1860_v50 = vld [vmem:[%s2611_s1 + $0x7] ss:$0 sm:$0xff]  ;;  %v1861_v55 = vld [vmem:[%s2611_s1 + $0x7] sm:$0xfe] }
 0x25c   : >> { %v1859_v49 = vld [vmem:[%s2611_s1 - $0x1] sm:$0xfe]  ;;  %v1862_v56 = vld [vmem:[%s2611_s1 + $0xf] ss:$0 sm:$0xff]  ;;  %v1177_v58 = vsel %vm1015_vm8, %v1860_v50, %v1861_v55  ;;  %v1866_v61 = vld [vmem:[%s2613_s12 + $0x8] ss:$0 sm:$0xff] }
 0x25d   : >> { %v1166_v54 = vsel %vm1015_vm8, %v1159_v48, %v1859_v49  ;;  %v1203_v57 = vld [vmem:[%s2616_s13] ss:$0 sm:$0xff]  ;;  %v1865_v60 = vld [vmem:[%s2613_s12 + $0x9] sm:$0x7f]  ;;  %1863 = vst [vmem:[%s2611_s1 + $0x8] sm:$0xff] %v1177_v58  ;;  %v848_v48 = vadd.s32 8, %v838_v15 }
 0x25e   : >> { %1169 = vst [vmem:[%s2611_s1] sm:$0xff] %v1166_v54  ;;  %v1181_v59 = vld [vmem:[%s2613_s12] ss:$0 sm:$0xff]  ;;  %v1190_v62 = vsel %vm1039_vm9, %v1862_v56, %v1865_v60  ;;  %v1868_v63 = vld [vmem:[%s2613_s12 + $0x1] sm:$0x7f]  ;;  %v1871_v4 = vld [vmem:[%s2616_s13 + $0x7] sm:$0xfe] }
 0x25f   : >> { %1864 = vst [vmem:[%s2611_s1 + $0x1] sm:$0x1] %v1181_v59  ;;  %v1869_v0 = vld [vmem:[%s2616_s13 - $0x1] sm:$0xfe]  ;;  %v1870_v1 = vld [vmem:[%s2616_s13 + $0x7] ss:$0 sm:$0xff]  ;;  %v1198_v2 = vsel %vm1039_vm9, %v1866_v61, %v1868_v63  ;;  %vm849_vm15 = vcmp.eq.s32.totalorder %v848_v48, %v835_v14 }
 0x260   : >> { %1867 = vst [vmem:[%s2613_s12 + $0x8] sm:$0xff] %v1190_v62  ;;  %v1210_v3 = vsel %vm1015_vm8, %v1203_v57, %v1869_v0  ;;  %v1872_v5 = vld [vmem:[%s2616_s13 + $0xf] ss:$0 sm:$0xff]  ;;  %v1225_v6 = vld [vmem:[%s2624_s17] ss:$0 sm:$0xff]  ;;  %1200 = vst [vmem:[%s2613_s12] sm:$0xff] %v1198_v2  ;;  %v1221_v7 = vsel %vm1015_vm8, %v1870_v1, %v1871_v4  ;;  %v871_v49 = vadd.s32 8, %v859_v15  ;;  %v353_v15 = vmov (%p478_p9), %v2495_v15 }
 0x261   : >> { %1213 = vst [vmem:[%s2616_s13] sm:$0xff] %v1210_v3  ;;  %v1875_v8 = vld [vmem:[%s2624_s17 + $0x9] sm:$0x7f]  ;;  %v1876_v9 = vld [vmem:[%s2624_s17 + $0x8] ss:$0 sm:$0xff]  ;;  %v1878_v10 = vld [vmem:[%s2624_s17 + $0x1] sm:$0x7f] }
 0x262   : >> { %1873 = vst [vmem:[%s2616_s13 + $0x8] sm:$0xff] %v1221_v7  ;;  %1874 = vst [vmem:[%s2616_s13 + $0x1] sm:$0x1] %v1225_v6  ;;  %v1234_v13 = vsel %vm1039_vm9, %v1872_v5, %v1875_v8  ;;  %v1242_v16 = vsel %vm1039_vm9, %v1876_v9, %v1878_v10  ;;  %v742_v17 = vld [vmem:[%s2626_s2] sm:$0xff]  ;;  %vm872_vm1 = vcmp.eq.s32.totalorder %v871_v49, %v856_v14  ;;  %s2730_s1 = smov [#allocation15]  ;;  %s2733_s12 = smov [#allocation17]  ;;  %v350_v14 = vmov (%p478_p9), %v2493_v14 }
 0x263   : >> { %v744_v19 = vld [vmem:[%s2631_s19] sm:$0xff]  ;;  %1877 = vst [vmem:[%s2624_s17 + $0x8] sm:$0xff] %v1234_v13  ;;  %1244 = vst [vmem:[%s2624_s17] sm:$0xff] %v1242_v16  ;;  %v746_v20 = vmul.f32 %v742_v17, %v2638_v52  ;;  %v749_v21 = vmul.f32 %v742_v17, %v2636_v51  ;;  %s2402_s13 = smov 127   ;;  %s2744_s17 = smov [#allocation18]  ;;  %vm365_vm6 = vcmp.eq.s32.totalorder (%p478_p9), %v353_v15, %v350_v14  ;;  %v379_v14 = vmov (%p478_p9), %v2493_v14 }
 0x264   : >> { %v752_v23 = vmul.f32 %v744_v19, %v2638_v52  ;;  %v755_v25 = vmul.f32 %v744_v19, %v2636_v51  ;;  %v797_v50 = vld [vmem:[%s790_s0] ss:$0 sm:$0xff]  ;;  %s406_s0 = smov (%p478_p9), [#allocation17] }
 0x265   : >> { %v747_v26 = vsub.f32 %v745_v11, %v746_v20  ;;  %v750_v27 = vadd.f32 %v749_v21, %v748_v12 }
 0x266   : >> { %v753_v28 = vsub.f32 %v751_v22, %v752_v23  ;;  %v756_v29 = vadd.f32 %v755_v25, %v754_v24 }
 0x267   : >> { %757 = vst [vmem:[%s2621_s16] sm:$0xff] %v747_v26  ;;  %758 = vst [vmem:[%s2626_s2] sm:$0xff] %v750_v27  ;;  %s2742_s16 = smov [#allocation17]  ;;  %s2782_s2 = smov [#allocation15] }
 0x268   : >> { %759 = vst [vmem:[%s2629_s18] sm:$0xff] %v753_v28  ;;  %760 = vst [vmem:[%s2631_s19] sm:$0xff] %v756_v29  ;;  %s2786_s18 = smov [#allocation16]  ;;  %s2791_s19 = smov [#allocation17] }
 0x26e   : >> { %v1801_v30 = vld [vmem:[%s761_s20 + $0x8] sm:$0xff] }
 0x26f   : >> { %v1802_v31 = vld [vmem:[%s763_s21 + $0x8] sm:$0xff]  ;;  %v776_v34 = vmul.f32 %v1801_v30, %v2638_v52  ;;  %v773_v36 = vmul.f32 %v1801_v30, %v2636_v51 }
 0x270   : >> { %v1803_v32 = vld [vmem:[%s765_s22 + $0x8] sm:$0xff]  ;;  %v774_v33 = vmul.f32 %v1802_v31, %v2638_v52  ;;  %v777_v35 = vmul.f32 %v1802_v31, %v2636_v51 }
 0x271   : >> { %v1804_v37 = vld [vmem:[%s767_s3 + $0x8] sm:$0xff]  ;;  %v779_v38 = vmul.f32 %v1803_v32, %v2636_v51  ;;  %v782_v40 = vmul.f32 %v1803_v32, %v2638_v52 }
 0x272   : >> { %v780_v39 = vmul.f32 %v1804_v37, %v2638_v52  ;;  %v783_v41 = vmul.f32 %v1804_v37, %v2636_v51  ;;  %v778_v42 = vadd.f32 %v777_v35, %v776_v34  ;;  %v775_v43 = vsub.f32 %v773_v36, %v774_v33  ;;  %v860_v51 = vld [vmem:[%s853_s23] ss:$0 sm:$0xff] }
 0x274   : >> { %v781_v44 = vsub.f32 %v779_v38, %v780_v39  ;;  %v784_v45 = vadd.f32 %v783_v41, %v782_v40  ;;  %1806 = vst [vmem:[%s763_s21 + $0x8] sm:$0xff] %v778_v42  ;;  %1805 = vst [vmem:[%s761_s20 + $0x8] sm:$0xff] %v775_v43  ;;  %s1052_s20 = smov [#allocation18]  ;;  %s1245_s21 = sadd.s32 (%p478_p9), 1, %s2394_s10  }
 0x275   : > { %p474_p10 = scmp.ge.s32.totalorder (%p478_p9), %s1245_s21, 15  ;;  %s2903_s10 = smov (%p478_p9), %s1245_s21 }
 0x276   : >> { %1807 = vst [vmem:[%s765_s22 + $0x8] sm:$0xff] %v781_v44  ;;  %1808 = vst [vmem:[%s767_s3 + $0x8] sm:$0xff] %v784_v45  ;;  %s354_s22 = smov (%p478_p9), [#allocation15]  ;;  %s383_s3 = smov (%p478_p9), [#allocation16] }
 0x27b   : >> { %v819_v52 = vld [vmem:[%s812_s24] sm:$0xff]  ;;  %v1811_v53 = vld [vmem:[%s812_s24 + $0x8] sm:$0xff] }
 0x27c   : >> { %v798_v54 = vld [vmem:[%s2712_s25] sm:$0xff]  ;;  %v823_v55 = vsel %vm822_vm10, 0.0, %v819_v52  ;;  %v830_v56 = vsel %vm829_vm11, 0.0, %v1811_v53  ;;  %v1809_v58 = vld [vmem:[%s2712_s25 + $0x8] sm:$0xff] }
 0x27d   : >> { %v802_v57 = vsel %vm801_vm12, %v797_v50, %v798_v54  ;;  %v839_v59 = vld [vmem:[%s832_s26] sm:$0xff]  ;;  %v1813_v60 = vld [vmem:[%s832_s26 + $0x8] sm:$0xff]  ;;  %824 = vst [vmem:[%s812_s24] sm:$0xff] %v823_v55  ;;  %1812 = vst [vmem:[%s812_s24 + $0x8] sm:$0xff] %v830_v56  ;;  %v810_v61 = vsel %vm809_vm13, %v797_v50, %v1809_v58 }
 0x27e   : >> { %803 = vst [vmem:[%s2712_s25] sm:$0xff] %v802_v57  ;;  %v843_v62 = vsel %vm842_vm14, 0.0, %v839_v59  ;;  %v850_v63 = vsel %vm849_vm15, 0.0, %v1813_v60  ;;  %v861_v0 = vld [vmem:[%s852_s27] sm:$0xff]  ;;  %v1815_v1 = vld [vmem:[%s852_s27 + $0x8] sm:$0xff]  ;;  %1810 = vst [vmem:[%s2712_s25 + $0x8] sm:$0xff] %v810_v61 }
 0x27f   : >> { %844 = vst [vmem:[%s832_s26] sm:$0xff] %v843_v62  ;;  %1814 = vst [vmem:[%s832_s26 + $0x8] sm:$0xff] %v850_v63  ;;  %v865_v2 = vsel %vm864_vm0, %v860_v51, %v861_v0  ;;  %v873_v3 = vsel %vm872_vm1, %v860_v51, %v1815_v1 }
 0x280   : >> { %866 = vst [vmem:[%s852_s27] sm:$0xff] %v865_v2  ;;  %1816 = vst [vmem:[%s852_s27 + $0x8] sm:$0xff] %v873_v3 }
 0x284   : >> { %v877_v4 = vld [vmem:[%s2724_s28] sm:$0xff]  ;;  %v1817_v9 = vld [vmem:[%s2739_s15 + $0x8] sm:$0xff] }
 0x285   : >> { %878 = vrot.lane.b32.xlu1 %v877_v4, %s2401_s30  ;;  %v881_v5 = vld [vmem:[%s2726_s29] sm:$0xff]  ;;  %v1819_v6 = vld [vmem:[%s2730_s1 + $0x8] sm:$0xff] }
 0x286   : >> { %882 = vrot.lane.b32.xlu0 %v881_v5, %s2401_s30  ;;  %v947_v7 = vld [vmem:[%s2733_s12] sm:$0xff]  ;;  %v1825_v10 = vld [vmem:[%s2742_s16 + $0x8] sm:$0xff] }
 0x287   : >> { %v943_v8 = vld [vmem:[%s2735_s14] sm:$0xff]  ;;  %v1823_v11 = vld [vmem:[%s2744_s17 + $0x8] sm:$0xff] }
 0x289   : >> { %914 = vrot.lane.b32.xlu1 %v1819_v6, %s2401_s30 }
 0x28a   : >> { %899 = vrot.lane.b32.xlu0 %v877_v4, %s2402_s13 }
 0x28d   : >> { %948 = vrot.lane.b32.xlu1 %v947_v7, %s2401_s30 }
 0x28e   : >> { %944 = vrot.lane.b32.xlu0 %v943_v8, %s2401_s30 }
 0x291   : >> { %910 = vrot.lane.b32.xlu1 %v1817_v9, %s2401_s30 }
 0x292   : >> { %931 = vrot.lane.b32.xlu0 %v1817_v9, %s2402_s13 }
 0x295   : >> { %980 = vrot.lane.b32.xlu1 %v1825_v10, %s2401_s30 }
 0x296   : >> { %976 = vrot.lane.b32.xlu0 %v1823_v11, %s2401_s30 }
 0x299   : >> { %965 = vrot.lane.b32.xlu1 %v943_v8, %s2402_s13 }
 0x29d   : >> { %997 = vrot.lane.b32.xlu1 %v1823_v11, %s2402_s13 }
 0x2f7   : >> { %v879_v12 = vpop.permute.xlu1 %878 }
 0x2f8   : >> { %v883_v13 = vpop.permute.xlu0 %882 }
 0x2f9   : >> { %v887_v16 = vsel %vm886_vm2, %v881_v5, %v883_v13 }
 0x2fa   : >> { %v891_v17 = vsel %vm890_vm3, %v879_v12, %v887_v16 }
 0x2fb   : >> { %v897_v18 = vsel %vm1611_vm4, %v891_v17, 0.0  ;;  %v915_v19 = vpop.permute.xlu1 %914 }
 0x2fc   : >> { %v900_v20 = vpop.permute.xlu0 %899  ;;  %937 = vst [vmem:[%s2726_s29] sm:$0xff] %v897_v18  ;;  %v919_v27 = vsel %vm886_vm2, %v1819_v6, %v915_v19 }
 0x2fd   : >> { %v904_v21 = vsel %vm903_vm5, %v881_v5, %v900_v20 }
 0x2fe   : >> { %938 = vst [vmem:[%s2724_s28] sm:$0xff] %v904_v21 }
 0x2ff   : >> { %v949_v22 = vpop.permute.xlu1 %948 }
 0x300   : >> { %v953_v23 = vsel %vm886_vm2, %v947_v7, %v949_v22  ;;  %v945_v24 = vpop.permute.xlu0 %944 }
 0x301   : >> { %v957_v25 = vsel %vm890_vm3, %v945_v24, %v953_v23 }
 0x302   : >> { %v963_v26 = vsel %vm1611_vm4, %v957_v25, 0.0 }
 0x303   : >> { %v911_v28 = vpop.permute.xlu1 %910  ;;  %1003 = vst [vmem:[%s2733_s12] sm:$0xff] %v963_v26 }
 0x304   : >> { %v923_v29 = vsel %vm890_vm3, %v911_v28, %v919_v27  ;;  %v932_v30 = vpop.permute.xlu0 %931 }
 0x305   : >> { %v929_v31 = vsel %vm1611_vm4, %v923_v29, 0.0  ;;  %v936_v32 = vsel %vm903_vm5, %v1819_v6, %v932_v30 }
 0x306   : >> { %1821 = vst [vmem:[%s2730_s1 + $0x8] sm:$0xff] %v929_v31  ;;  %1822 = vst [vmem:[%s2739_s15 + $0x8] sm:$0xff] %v936_v32 }
 0x307   : >> { %v981_v33 = vpop.permute.xlu1 %980 }
 0x308   : >> { %v985_v34 = vsel %vm886_vm2, %v1825_v10, %v981_v33  ;;  %v977_v35 = vpop.permute.xlu0 %976 }
 0x309   : >> { %v989_v36 = vsel %vm890_vm3, %v977_v35, %v985_v34 }
 0x30a   : >> { %v995_v37 = vsel %vm1611_vm4, %v989_v36, 0.0 }
 0x30b   : >> { %v966_v38 = vpop.permute.xlu1 %965  ;;  %1827 = vst [vmem:[%s2742_s16 + $0x8] sm:$0xff] %v995_v37 }
 0x30c   : >> { %v970_v39 = vsel %vm903_vm5, %v947_v7, %v966_v38  ;;  %v372_v7 = vadd.s32 (%p478_p9), 8, %v353_v15  ;;  %v382_v15 = vmov (%p478_p9), %v2495_v15 }
 0x30d   : >> { %v1009_v40 = vld [vmem:[%s2782_s2] ss:$0 sm:$0xff]  ;;  %v1830_v42 = vld [vmem:[%s2782_s2 + $0x7] ss:$0 sm:$0xff]  ;;  %1004 = vst [vmem:[%s2735_s14] sm:$0xff] %v970_v39  ;;  %v1831_v44 = vld [vmem:[%s2782_s2 + $0x7] sm:$0xfe]  ;;  %v428_v15 = vmov (%p478_p9), %v2495_v15 }
 0x30e   : >> { %v1829_v41 = vld [vmem:[%s2782_s2 - $0x1] sm:$0xfe]  ;;  %v1027_v47 = vsel %vm1015_vm8, %v1830_v42, %v1831_v44  ;;  %v1840_v49 = vld [vmem:[%s2786_s18 + $0x7] ss:$0 sm:$0xff]  ;;  %v1841_v50 = vld [vmem:[%s2786_s18 + $0x7] sm:$0xfe]  ;;  %vm373_vm7 = vcmp.eq.s32.totalorder (%p478_p9), %v372_v7, %v350_v14  ;;  %v402_v14 = vmov (%p478_p9), %v2493_v14  ;;  %v405_v15 = vmov (%p478_p9), %v2495_v15 }
 0x30f   : >> { %v1016_v43 = vsel %vm1015_vm8, %v1009_v40, %v1829_v41  ;;  %v1053_v45 = vld [vmem:[%s2786_s18] ss:$0 sm:$0xff]  ;;  %v1842_v51 = vld [vmem:[%s2786_s18 + $0xf] ss:$0 sm:$0xff]  ;;  %v998_v52 = vpop.permute.xlu1 %997  ;;  %v1071_v53 = vsel %vm1015_vm8, %v1840_v49, %v1841_v50  ;;  %v425_v14 = vmov (%p478_p9), %v2493_v14  ;;  %v449_v36 = vadd.s32 (%p478_p9), 8, %v428_v15 }
 0x310   : >> { %v1839_v46 = vld [vmem:[%s2786_s18 - $0x1] sm:$0xfe]  ;;  %1019 = vst [vmem:[%s2782_s2] sm:$0xff] %v1016_v43  ;;  %v1002_v54 = vsel %vm903_vm5, %v1825_v10, %v998_v52  ;;  %v1832_v55 = vld [vmem:[%s2782_s2 + $0xf] ss:$0 sm:$0xff]  ;;  %1843 = vst [vmem:[%s2786_s18 + $0x8] sm:$0xff] %v1071_v53 }
 0x311   : >> { %v1060_v48 = vsel %vm1015_vm8, %v1053_v45, %v1839_v46  ;;  %1828 = vst [vmem:[%s2744_s17 + $0x8] sm:$0xff] %v1002_v54  ;;  %1833 = vst [vmem:[%s2782_s2 + $0x8] sm:$0xff] %v1027_v47  ;;  %vm440_vm8 = vcmp.eq.s32.totalorder (%p478_p9), %v428_v15, %v425_v14 }
 0x312   : >> { %1063 = vst [vmem:[%s2786_s18] sm:$0xff] %v1060_v48  ;;  %v1031_v56 = vld [vmem:[%s2791_s19] ss:$0 sm:$0xff]  ;;  %v1835_v57 = vld [vmem:[%s2791_s19 + $0x9] sm:$0x7f]  ;;  %v1836_v58 = vld [vmem:[%s2791_s19 + $0x8] ss:$0 sm:$0xff] }
 0x313   : >> { %1834 = vst [vmem:[%s2782_s2 + $0x1] sm:$0x1] %v1031_v56  ;;  %v1040_v59 = vsel %vm1039_vm9, %v1832_v55, %v1835_v57  ;;  %v1838_v60 = vld [vmem:[%s2791_s19 + $0x1] sm:$0x7f] }
 0x314   : >> { %1837 = vst [vmem:[%s2791_s19 + $0x8] sm:$0xff] %v1040_v59  ;;  %v1048_v61 = vsel %vm1039_vm9, %v1836_v58, %v1838_v60 }
 0x315   : >> { %1050 = vst [vmem:[%s2791_s19] sm:$0xff] %v1048_v61 }
 0x317   : > { %480 = sbr.rel (!%p478_p9) target bundleno = 311 (0x137), region = 388 }
 0x318   : >> { %v1075_v62 = vld [vmem:[%s1052_s20] ss:$0 sm:$0xff]  ;;  %v1845_v63 = vld [vmem:[%s1052_s20 + $0x9] sm:$0x7f]  ;;  %v1846_v0 = vld [vmem:[%s1052_s20 + $0x8] ss:$0 sm:$0xff] }
 0x319   : >> { %1844 = vst [vmem:[%s2786_s18 + $0x1] sm:$0x1] %v1075_v62  ;;  %v1084_v1 = vsel %vm1039_vm9, %v1842_v51, %v1845_v63  ;;  %v1848_v2 = vld [vmem:[%s1052_s20 + $0x1] sm:$0x7f] }
 0x31a   : >> { %1847 = vst [vmem:[%s1052_s20 + $0x8] sm:$0xff] %v1084_v1  ;;  %v1092_v3 = vsel %vm1039_vm9, %v1846_v0, %v1848_v2  ;;  %v360_v4 = vld [vmem:[%s354_s22] sm:$0xff] (%p478_p9)  ;;  %v1879_v5 = vld [vmem:[%s354_s22 + $0x8] sm:$0xff] (%p478_p9)  ;;  %vm450_vm9 = vcmp.eq.s32.totalorder (%p478_p9), %v449_v36, %v425_v14 }
 0x31b   : >> { %1094 = vst [vmem:[%s1052_s20] sm:$0xff] %v1092_v3  ;;  %v361_v8 = vsel (%p478_p9), %vm1611_vm4, %v360_v4, 0.0  ;;  %v369_v9 = vsel (%p478_p9), %vm1611_vm4, %v1879_v5, 0.0 }
 0x31c   : > { %v412_v12 = vld [vmem:[%s406_s0] sm:$0xff]  ;;  %v362_v13 = vmul.f32 %v361_v8, %v361_v8  ;;  %v370_v16 = vmul.f32 %v369_v9, %v369_v9  ;;  %v1881_v19 = vld [vmem:[%s406_s0 + $0x8] sm:$0xff] }
 0x31d   : > { %v413_v20 = vsel %vm1611_vm4, %v412_v12, 0.0  ;;  %v419_v24 = vsel %vm1611_vm4, %v1881_v19, 0.0 }
 0x31e   : > { %v376_v21 = vadd.f32 %v370_v16, %v362_v13  ;;  %v366_v25 = vsel %vm365_vm6, 0.0, %v362_v13  ;;  %v414_v27 = vmul.f32 %v413_v20, %v413_v20  ;;  %v374_v29 = vsel %vm373_vm7, 0.0, %v370_v16 }
 0x31f   : > { %v375_v31 = vadd.f32 %v374_v29, %v366_v25  ;;  %v420_v33 = vmul.f32 %v419_v24, %v419_v24 }
 0x320   : > { %v389_v6 = vld [vmem:[%s383_s3] sm:$0xff]  ;;  %v1880_v11 = vld [vmem:[%s383_s3 + $0x8] sm:$0xff] }
 0x321   : > { %v390_v10 = vsel %vm1611_vm4, %v389_v6, 0.0  ;;  %v396_v18 = vsel %vm1611_vm4, %v1880_v11, 0.0 }
 0x322   : > { %v391_v17 = vmul.f32 %v390_v10, %v390_v10  ;;  %v397_v22 = vmul.f32 %v396_v18, %v396_v18  ;;  %v435_v23 = vld [vmem:[%s429_s11] sm:$0xff]  ;;  %v1882_v28 = vld [vmem:[%s429_s11 + $0x8] sm:$0xff] }
 0x323   : > { %v436_v30 = vsel %vm1611_vm4, %v435_v23, 0.0  ;;  %v446_v34 = vsel %vm1611_vm4, %v1882_v28, 0.0 }
 0x324   : > { %v393_v26 = vadd.f32 %v391_v17, %v376_v21  ;;  %v392_v35 = vadd.f32 %v391_v17, %v375_v31  ;;  %v437_v38 = vmul.f32 %v436_v30, %v436_v30  ;;  %v447_v41 = vmul.f32 %v446_v34, %v446_v34 }
 0x326   : > { %v399_v32 = vadd.f32 %v397_v22, %v393_v26  ;;  %v398_v39 = vadd.f32 %v397_v22, %v392_v35  ;;  %v441_v44 = vsel %vm440_vm8, 0.0, %v437_v38  ;;  %v451_v47 = vsel %vm450_vm9, 0.0, %v447_v41 }
 0x328   : > { %v416_v37 = vadd.f32 %v414_v27, %v399_v32  ;;  %v415_v42 = vadd.f32 %v414_v27, %v398_v39 }
 0x32a   : > { %v422_v40 = vadd.f32 %v420_v33, %v416_v37  ;;  %v421_v45 = vadd.f32 %v420_v33, %v415_v42 }
 0x32c   : > { %v443_v43 = vadd.f32 %v437_v38, %v422_v40  ;;  %v442_v48 = vadd.f32 %v441_v44, %v421_v45 }
 0x32e   : > { %v453_v46 = vadd.f32 %v447_v41, %v443_v43  ;;  %v452_v49 = vadd.f32 %v451_v47, %v442_v48 }
 0x330   : > { %454 = vadd.xlane.f32.xlu0 %v453_v46 }
 0x334   : > { %462 = vadd.xlane.f32.xlu0 %v452_v49 }
 0x3b9   : > { %v455_v50 = vpop.xlane.xlu0 %454 }
 0x3ba   : > { %v456_v51 = vrot.slane %v455_v50, 4 }
 0x3bc   : > { %v457_v52 = vadd.f32 %v456_v51, %v455_v50 }
 0x3bd   : > { %v463_v53 = vpop.xlane.xlu0 %462 }
 0x3be   : > { %v458_v54 = vrot.slane %v457_v52, 2  ;;  %v464_v55 = vrot.slane %v463_v53, 4 }
 0x3c0   : > { %v465_v56 = vadd.f32 %v464_v55, %v463_v53  ;;  %v459_v57 = vadd.f32 %v458_v54, %v457_v52 }
 0x3c2   : > { %v466_v58 = vrot.slane %v465_v56, 2  ;;  %v460_v60 = vrot.slane %v459_v57, 1 }
 0x3c4   : > { %v467_v59 = vadd.f32 %v466_v58, %v465_v56  ;;  %v461_v63 = vadd.f32 %v460_v60, %v459_v57 }
 0x3c6   : > { %v468_v61 = vrot.slane %v467_v59, 1 }
 0x3c8   : > { %v469_v62 = vadd.f32 %v468_v61, %v467_v59 }
 0x3ca   : > { %1895 = vpush %v469_v62 }
 0x3cb   : > { %1897 = vpush %v461_v63 }
 0x3fb   : > { %s1896_s23 = spop %1895 }
 0x3fc   : > { %s1898_s24 = spop %1897 }
 0x3fd   : > { %s472_s25 = smul.f32 1e-10, %s1898_s24 }
 0x3ff   : > { %p473_p11 = scmp.le.f32.partialorder %s1896_s23, %s472_s25 }
 0x401   : > { %p475_p12 = por %p474_p10, %p473_p11 }
 0x403   :  { %1247 = sbr.rel (!%p475_p12) target bundleno = 310 (0x136), region = 399 }
 0x408 PF:  { %s1248_s26 = smov [#allocation15]  ;;  %v1252_v14 = vmov %v2493_v14  ;;  %v1255_v15 = vmov %v2495_v15  ;;  %s2403_s27 = smov [#allocation10]  }
 0x409   :  { %v1278_v14 = vmov %v2493_v14  ;;  %v1281_v15 = vmov %v2495_v15  ;;  %s1456_s28 = sshll.u32 %s2403_s27, 4  ;;  %v1256_v0 = vld [vmem:[%s1248_s26] sm:$0xff]  ;;  %vm1259_vm10 = vcmp.eq.s32.totalorder %v1255_v15, %v1252_v14  ;;  %v1883_v1 = vld [vmem:[%s1248_s26 + $0x8] sm:$0xff]  ;;  %v1264_v2 = vadd.s32 8, %v1255_v15  ;;  %s1274_s10 = smov [#allocation18]  ;;  %s1457_s28 = int_to_ptr.vmem [resolvable:$true] %s1456_s28 }
 0x40a   :  { %vm1285_vm11 = vcmp.eq.s32.totalorder %v1281_v15, %v1278_v14  ;;  %v1290_v3 = vadd.s32 8, %v1281_v15  ;;  %v1260_v4 = vsel %vm1259_vm10, %v1256_v0, 0.0  ;;  %s2154_s29 = scalar_lea.vmem %s1457_s28, 256  ;;  %p2159_p0 = scmp.lt.s32.totalorder %s1457_s28, %s1457_s28 }
 0x40b   :  { %p2155_p13 = scmp.ne.s32.totalorder %s1457_s28, %s2154_s29  ;;  %p2160_p1 = scmp.lt.s32.totalorder %s2154_s29, %s2154_s29 }
 0x40d   :  { %p2161_p2 = por %p2160_p1, %p2159_p0 }
 0x40f   :  { %p2162_p3 = pnand %p2161_p2, %p2155_p13 }
 0x411   :  { %2165 = shalt.err (!%p2162_p3)
}
 0x412   :  { %1459 = dma.vmem_to_hbm [thread:$0]  %s1457_s28, 256, %s2900_s7, [#allocation11]   ;;  %vm1265_vm4 = vcmp.eq.s32.totalorder %v1264_v2, %v1252_v14  ;;  %v1282_v5 = vld [vmem:[%s1274_s10] sm:$0xff]  ;;  %v1884_v6 = vld [vmem:[%s1274_s10 + $0x8] sm:$0xff]  ;;  %vm1291_vm12 = vcmp.eq.s32.totalorder %v1290_v3, %v1278_v14 }
 0x413   :  { %v1266_v7 = vsel %vm1265_vm4, %v1883_v1, %v1260_v4  ;;  %v1286_v8 = vsel %vm1285_vm11, %v1282_v5, 0.0  ;;  %s2404_s12 = smov [#allocation8]   ;;  %s2405_s14 = smov [#allocation12]  }
 0x414   :  { %v1267_v9 = vrot.slane %v1266_v7, 4  ;;  %v1292_v10 = vsel %vm1291_vm12, %v1884_v6, %v1286_v8  ;;  %s1449_s13 = sshll.u32 %s2404_s12, 4  ;;  %s1463_s15 = sshll.u32 %s2405_s14, 4  ;;  %s1450_s13 = int_to_ptr.vmem [resolvable:$true] %s1449_s13  ;;  %s1464_s15 = int_to_ptr.vmem [resolvable:$true] %s1463_s15 }
 0x415   :  { %v1293_v11 = vrot.slane %v1292_v10, 4  ;;  %s2174_s16 = scalar_lea.vmem %s1450_s13, 256  ;;  %p2179_p5 = scmp.lt.s32.totalorder %s1450_s13, %s1450_s13 }
 0x416   :  { %v1268_v12 = vadd.f32 %v1267_v9, %v1266_v7  ;;  %p2175_p4 = scmp.ne.s32.totalorder %s1450_s13, %s2174_s16  ;;  %p2180_p6 = scmp.lt.s32.totalorder %s2174_s16, %s2174_s16 }
 0x418   :  { %p2181_p7 = por %p2180_p6, %p2179_p5 }
 0x41a   :  { %p2182_p8 = pnand %p2181_p7, %p2175_p4 }
 0x41c   :  { %2185 = shalt.err (!%p2182_p8)
}
 0x41d   :  { %1452 = dma.vmem_to_hbm [thread:$0]  %s1450_s13, 256, %s2899_s6, [#allocation9]   ;;  %v1294_v14 = vadd.f32 %v1293_v11, %v1292_v10  ;;  %v1269_v15 = vrot.slane %v1268_v12, 2 }
 0x41e   :  { %s2194_s2 = scalar_lea.vmem %s1464_s15, 256  ;;  %p2199_p10 = scmp.lt.s32.totalorder %s1464_s15, %s1464_s15 }
 0x41f   :  { %p2195_p9 = scmp.ne.s32.totalorder %s1464_s15, %s2194_s2  ;;  %p2200_p11 = scmp.lt.s32.totalorder %s2194_s2, %s2194_s2 }
 0x421   :  { %p2201_p12 = por %p2200_p11, %p2199_p10 }
 0x423   :  { %p2202_p13 = pnand %p2201_p12, %p2195_p9 }
 0x425   :  { %2205 = shalt.err (!%p2202_p13)
}
 0x426   :  { %1466 = dma.vmem_to_hbm [thread:$0]  %s1464_s15, 256, %s2901_s8, [#allocation11]   ;;  %v1295_v13 = vrot.slane %v1294_v14, 2  ;;  %v1270_v16 = vadd.f32 %v1269_v15, %v1268_v12 }
 0x427   :  { %s2406_s20 = smov [#allocation13]  }
 0x428   :  { %s1470_s21 = sshll.u32 %s2406_s20, 4  ;;  %v1296_v17 = vadd.f32 %v1295_v13, %v1294_v14  ;;  %s1471_s21 = int_to_ptr.vmem [resolvable:$true] %s1470_s21 }
 0x429   :  { %s2214_s6 = scalar_lea.vmem %s1471_s21, 256  ;;  %p2219_p1 = scmp.lt.s32.totalorder %s1471_s21, %s1471_s21 }
 0x42a   :  { %p2215_p0 = scmp.ne.s32.totalorder %s1471_s21, %s2214_s6  ;;  %p2220_p2 = scmp.lt.s32.totalorder %s2214_s6, %s2214_s6 }
 0x42c   :  { %p2221_p3 = por %p2220_p2, %p2219_p1 }
 0x42e   :  { %p2222_p4 = pnand %p2221_p3, %p2215_p0 }
 0x430   :  { %2225 = shalt.err (!%p2222_p4)
}
 0x431   :  { %1473 = dma.vmem_to_hbm [thread:$0]  %s1471_s21, 256, %s2902_s9, [#allocation14]   ;;  %v1271_v18 = vrot.slane %v1270_v16, 1  ;;  %v1297_v19 = vrot.slane %v1296_v17, 1 }
 0x432   :  { %s1249_s0 = smov [#allocation4]  ;;  %s1275_s8 = smov [#allocation6] }
 0x433   :  { %v1272_v20 = vadd.f32 %v1271_v18, %v1270_v16  ;;  %v1298_v21 = vadd.f32 %v1297_v19, %v1296_v17 }
 0x435   :  { %1273 = vst [vmem:[%s1249_s0] sm:$0x1] %v1272_v20  ;;  %1299 = vst [vmem:[%s1275_s8] sm:$0x1] %v1298_v21 }
 0x43c   :  { %v1304_v22 = vld [vmem:[#allocation4] sm:$0x1]  ;;  %v1312_v23 = vld [vmem:[#allocation6] sm:$0x1] }
 0x43d   :  { %1307 = vst [vmem:[#allocation5] sm:$0x1] %v1304_v22  ;;  %1315 = vst [vmem:[#allocation7] sm:$0x1] %v1312_v23 }
 0x444   :  { %v1379_v24 = vld [vmem:[#allocation5] sm:$0x1]  ;;  %v1444_v25 = vld [vmem:[#allocation7] sm:$0x1] }
 0x445   :  { %1380 = vst [vmem:[%s2897_s4] sm:$0x1] %v1379_v24  ;;  %1445 = vst [vmem:[%s2898_s5] sm:$0x1] %v1444_v25 }
 0x446   :  { %2354 = dma.done.wait [#allocation9], 256  }
 0x447   :  { %2355 = vsyncadd [#allocation9], 4294967040 }
 0x448   :  { %2356 = dma.done.wait [#allocation11], 512  }
 0x449   :  { %2357 = vsyncadd [#allocation11], 4294966784 }
 0x44a   :  { %2358 = dma.done.wait [#allocation14], 256  }
 0x44b   :  { %2359 = vsyncadd [#allocation14], 4294967040 }
 0x44c   :  { %1482 = vsyncpa [#allocation9], 1 }
 0x44d   :  { %1483 = vsyncpa [#allocation11], 1 }
 0x44e   :  { %1484 = vsyncpa [#allocation14], 1 }

// kernel: pfc_forward.1
= control target key start
LH: loop header
LB: loop body
LE: loop exit
PB: predicated region body
PF: predicated region fallthrough
CT: control target
= control target key end

     0   :  { %11 = vsyncpa [#allocation3], 0  ;;  %v2589_v1 = vmov 0.0   ;;  %vm2590_vm0 = vmmov 0   ;;  %s2971_s0 = inlined_call_operand.vmem [shape: f32[8,32], index: 0, kind: input, shape index: {}]   ;;  %s2972_s1 = inlined_call_operand.vmem [shape: f32[32,32], index: 1, kind: input, shape index: {}]   ;;  %s2973_s2 = inlined_call_operand.vmem [shape: f32[16,32], index: 2, kind: input, shape index: {}]   ;;  %s2974_s3 = inlined_call_operand.vmem [shape: f32[8,32], index: 3, kind: input, shape index: {}]   ;;  %s2975_s4 = inlined_call_operand.hbm [shape: f32[8,16], index: 4, kind: output, shape index: {0}]   ;;  %s2976_s5 = inlined_call_operand.hbm [shape: f32[8,32], index: 5, kind: output, shape index: {1}]  }
   0x1   :  { %v2626_v0 = vld [vmem:[%s2972_s1 + $0x18] sm:$0xff]  ;;  %2259 = vmatprep.subr.mxu0 %v2589_v1  ;;  %v2632_v2 = vld [vmem:[%s2972_s1 + $0x10] sm:$0xff]  ;;  %2267 = vmatprep.mubr.msk.f32.mxu0 %vm2590_vm0, %v2589_v1 }
   0x2   :  { %2260 = vmatpush3.msra.mxu0 %v2626_v0  ;;  %2270 = vmatprep.subr.mxu1 %v2589_v1 }
   0x3   :  { %12 = vsyncpa [#allocation5], 0  ;;  %2261 = vmatprep.subr.mxu0 %v2589_v1  ;;  %v2642_v3 = vld [vmem:[%s2972_s1 + $0x8] sm:$0xff]  ;;  %2271 = vmatpush3.msra.mxu1 %v2626_v0  ;;  %v2651_v4 = vld [vmem:[%s2972_s1] sm:$0xff]  ;;  %vm29_vm1 = vcmask 261120   ;;  %s2591_s6 = smov [#allocation4]  }
   0x4   :  { %2262 = vmatpush3.msra.mxu0 %v2632_v2  ;;  %2272 = vmatprep.subr.mxu1 %v2589_v1  ;;  %v28_v5 = vld [vmem:[%s2974_s3] sm:$0xff]  ;;  %s2091_s7 = sshll.u32 %s2591_s6, 4  ;;  %s2092_s7 = int_to_ptr.vmem [resolvable:$true] %s2091_s7 }
   0x5   :  { %2263 = vmatprep.subr.mxu0 %v2589_v1  ;;  %2273 = vmatpush3.msra.mxu1 %v2632_v2  ;;  %v2682_v6 = vld [vmem:[%s2971_s0] sm:$0xff]  ;;  %s2545_s8 = scalar_lea.vmem %s2092_s7, 128  ;;  %p2550_p1 = scmp.lt.s32.totalorder %s2092_s7, %s2092_s7 }
   0x6   :  { %2264 = vmatpush3.msra.mxu0 %v2642_v3  ;;  %2274 = vmatprep.subr.mxu1 %v2589_v1  ;;  %p2546_p0 = scmp.ne.s32.totalorder %s2092_s7, %s2545_s8  ;;  %p2551_p2 = scmp.lt.s32.totalorder %s2545_s8, %s2545_s8 }
   0x7   :  { %2265 = vmatprep.subr.mxu0 %v2589_v1  ;;  %2275 = vmatpush3.msra.mxu1 %v2642_v3 }
   0x8   :  { %2266 = vmatpush3.msra.mxu0 %v2651_v4  ;;  %2276 = vmatprep.subr.mxu1 %v2589_v1  ;;  %p2552_p3 = por %p2551_p2, %p2550_p1 }
   0x9   :  { %2268 = vmatmul.mubr.msk.f32.vlgmr.msra.gmra.mxu0 %vm29_vm1, %v28_v5  ;;  %2277 = vmatpush3.msra.mxu1 %v2651_v4 }
   0xa   :  { %2278 = vmatprep.mubr.msk.f32.mxu1 %vm2590_vm0, %v2589_v1  ;;  %2281 = vmatprep.subr.mxu0 %v2589_v1  ;;  %p2553_p4 = pnand %p2552_p3, %p2546_p0 }
   0xb   :  { %2282 = vmatpush3.msra.mxu0 %v2626_v0  ;;  %2289 = vmatprep.mubr.msk.f32.mxu0 %vm2590_vm0, %v2589_v1 }
   0xc   :  { %2283 = vmatprep.subr.mxu0 %v2589_v1  ;;  %2292 = vmatprep.subr.mxu1 %v2589_v1 }
   0xd   :  { %2284 = vmatpush3.msra.mxu0 %v2632_v2 }
   0xe   :  { %2285 = vmatprep.subr.mxu0 %v2589_v1 }
   0xf   :  { %2286 = vmatpush3.msra.mxu0 %v2642_v3 }
  0x10   :  { %2287 = vmatprep.subr.mxu0 %v2589_v1 }
  0x11   :  { %2288 = vmatpush3.msra.mxu0 %v2651_v4 }
  0x12   :  { %2303 = vmatprep.subr.mxu0 %v2589_v1 }
  0xc9   :  { %v99_v7 = vpop.f32.mrf.mxu0 }
  0xca   :  { %v103_v8 = vsub.f32 %v99_v7, %v2682_v6 }
  0xcb   :  { %v2269_v9 = vpop.f32.mrf.mxu0 }
  0xcc   :  { %v104_v10 = vsub.f32 %v28_v5, %v103_v8 }
  0xce   :  { %v105_v11 = vmax.f32 %v104_v10, 0.0 }
  0xd0   :  { %2279 = vmatmul.mubr.msk.f32.vlgmr.msra.gmra.mxu1 %vm29_vm1, %v105_v11 }
  0xd1   :  { %2293 = vmatpush3.msra.mxu1 %v2626_v0  ;;  %2300 = vmatprep.mubr.msk.f32.mxu1 %vm2590_vm0, %v2589_v1 }
  0xd2   :  { %2294 = vmatprep.subr.mxu1 %v2589_v1 }
  0xd3   :  { %2295 = vmatpush3.msra.mxu1 %v2632_v2 }
  0xd4   :  { %2296 = vmatprep.subr.mxu1 %v2589_v1 }
  0xd5   :  { %2297 = vmatpush3.msra.mxu1 %v2642_v3 }
  0xd6   :  { %2298 = vmatprep.subr.mxu1 %v2589_v1 }
  0xd7   :  { %2299 = vmatpush3.msra.mxu1 %v2651_v4 }
  0xd8   :  { %2314 = vmatprep.subr.mxu1 %v2589_v1 }
 0x190   :  { %v175_v12 = vpop.f32.mrf.mxu1 }
 0x191   :  { %v179_v13 = vsub.f32 %v175_v12, %v2682_v6 }
 0x192   :  { %v2280_v14 = vpop.f32.mrf.mxu1 }
 0x193   :  { %v180_v15 = vsub.f32 %v105_v11, %v179_v13 }
 0x195   :  { %v181_v16 = vmax.f32 %v180_v15, 0.0 }
 0x197   :  { %v182_v17 = vsub.f32 %v181_v16, %v105_v11 }
 0x199   :  { %v183_v18 = vmul.f32 0.2817535, %v182_v17 }
 0x19b   :  { %v184_v19 = vadd.f32 %v183_v18, %v181_v16 }
 0x19d   :  { %2290 = vmatmul.mubr.msk.f32.vlgmr.msra.gmra.mxu0 %vm29_vm1, %v184_v19 }
 0x19e   :  { %2304 = vmatpush3.msra.mxu0 %v2626_v0  ;;  %2311 = vmatprep.mubr.msk.f32.mxu0 %vm2590_vm0, %v2589_v1 }
 0x19f   :  { %2305 = vmatprep.subr.mxu0 %v2589_v1 }
 0x1a0   :  { %2306 = vmatpush3.msra.mxu0 %v2632_v2 }
 0x1a1   :  { %2307 = vmatprep.subr.mxu0 %v2589_v1 }
 0x1a2   :  { %2308 = vmatpush3.msra.mxu0 %v2642_v3 }
 0x1a3   :  { %2309 = vmatprep.subr.mxu0 %v2589_v1 }
 0x1a4   :  { %2310 = vmatpush3.msra.mxu0 %v2651_v4 }
 0x1a5   :  { %2325 = vmatprep.subr.mxu0 %v2589_v1 }
 0x25d   :  { %v254_v20 = vpop.f32.mrf.mxu0 }
 0x25e   :  { %v258_v21 = vsub.f32 %v254_v20, %v2682_v6 }
 0x25f   :  { %v2291_v22 = vpop.f32.mrf.mxu0 }
 0x260   :  { %v259_v23 = vsub.f32 %v184_v19, %v258_v21 }
 0x262   :  { %v260_v24 = vmax.f32 %v259_v23, 0.0 }
 0x264   :  { %v261_v25 = vsub.f32 %v260_v24, %v181_v16 }
 0x266   :  { %v262_v26 = vmul.f32 0.43404278, %v261_v25 }
 0x268   :  { %v263_v27 = vadd.f32 %v262_v26, %v260_v24 }
 0x26a   :  { %2301 = vmatmul.mubr.msk.f32.vlgmr.msra.gmra.mxu1 %vm29_vm1, %v263_v27 }
 0x26b   :  { %2315 = vmatpush3.msra.mxu1 %v2626_v0  ;;  %2322 = vmatprep.mubr.msk.f32.mxu1 %vm2590_vm0, %v2589_v1 }
 0x26c   :  { %2316 = vmatprep.subr.mxu1 %v2589_v1 }
 0x26d   :  { %2317 = vmatpush3.msra.mxu1 %v2632_v2 }
 0x26e   :  { %2318 = vmatprep.subr.mxu1 %v2589_v1 }
 0x26f   :  { %2319 = vmatpush3.msra.mxu1 %v2642_v3 }
 0x270   :  { %2320 = vmatprep.subr.mxu1 %v2589_v1 }
 0x271   :  { %2321 = vmatpush3.msra.mxu1 %v2651_v4 }
 0x272   :  { %2336 = vmatprep.subr.mxu1 %v2589_v1 }
 0x32a   :  { %v333_v28 = vpop.f32.mrf.mxu1 }
 0x32b   :  { %v337_v29 = vsub.f32 %v333_v28, %v2682_v6 }
 0x32c   :  { %v2302_v30 = vpop.f32.mrf.mxu1 }
 0x32d   :  { %v338_v31 = vsub.f32 %v263_v27, %v337_v29 }
 0x32f   :  { %v339_v32 = vmax.f32 %v338_v31, 0.0 }
 0x331   :  { %v340_v33 = vsub.f32 %v339_v32, %v260_v24 }
 0x333   :  { %v341_v34 = vmul.f32 0.5310638, %v340_v33 }
 0x335   :  { %v342_v35 = vadd.f32 %v341_v34, %v339_v32 }
 0x337   :  { %2312 = vmatmul.mubr.msk.f32.vlgmr.msra.gmra.mxu0 %vm29_vm1, %v342_v35 }
 0x338   :  { %2326 = vmatpush3.msra.mxu0 %v2626_v0  ;;  %2333 = vmatprep.mubr.msk.f32.mxu0 %vm2590_vm0, %v2589_v1 }
 0x339   :  { %2327 = vmatprep.subr.mxu0 %v2589_v1 }
 0x33a   :  { %2328 = vmatpush3.msra.mxu0 %v2632_v2 }
 0x33b   :  { %2329 = vmatprep.subr.mxu0 %v2589_v1 }
 0x33c   :  { %2330 = vmatpush3.msra.mxu0 %v2642_v3 }
 0x33d   :  { %2331 = vmatprep.subr.mxu0 %v2589_v1 }
 0x33e   :  { %2332 = vmatpush3.msra.mxu0 %v2651_v4 }
 0x33f   :  { %2347 = vmatprep.subr.mxu0 %v2589_v1 }
 0x3f7   :  { %v412_v36 = vpop.f32.mrf.mxu0 }
 0x3f8   :  { %v416_v37 = vsub.f32 %v412_v36, %v2682_v6 }
 0x3f9   :  { %v2313_v38 = vpop.f32.mrf.mxu0 }
 0x3fa   :  { %v417_v39 = vsub.f32 %v342_v35, %v416_v37 }
 0x3fc   :  { %v418_v40 = vmax.f32 %v417_v39, 0.0 }
 0x3fe   :  { %v419_v41 = vsub.f32 %v418_v40, %v339_v32 }
 0x400   :  { %v420_v42 = vmul.f32 0.5987786, %v419_v41 }
 0x402   :  { %v421_v43 = vadd.f32 %v420_v42, %v418_v40 }
 0x404   :  { %2323 = vmatmul.mubr.msk.f32.vlgmr.msra.gmra.mxu1 %vm29_vm1, %v421_v43 }
 0x405   :  { %2337 = vmatpush3.msra.mxu1 %v2626_v0  ;;  %2344 = vmatprep.mubr.msk.f32.mxu1 %vm2590_vm0, %v2589_v1 }
 0x406   :  { %2338 = vmatprep.subr.mxu1 %v2589_v1 }
 0x407   :  { %2339 = vmatpush3.msra.mxu1 %v2632_v2 }
 0x408   :  { %2340 = vmatprep.subr.mxu1 %v2589_v1 }
 0x409   :  { %2341 = vmatpush3.msra.mxu1 %v2642_v3 }
 0x40a   :  { %2342 = vmatprep.subr.mxu1 %v2589_v1 }
 0x40b   :  { %2343 = vmatpush3.msra.mxu1 %v2651_v4 }
 0x40c   :  { %2358 = vmatprep.subr.mxu1 %v2589_v1 }
 0x4c4   :  { %v491_v44 = vpop.f32.mrf.mxu1 }
 0x4c5   :  { %v495_v45 = vsub.f32 %v491_v44, %v2682_v6 }
 0x4c6   :  { %v2324_v46 = vpop.f32.mrf.mxu1 }
 0x4c7   :  { %v496_v47 = vsub.f32 %v421_v43, %v495_v45 }
 0x4c9   :  { %v497_v48 = vmax.f32 %v496_v47, 0.0 }
 0x4cb   :  { %v498_v49 = vsub.f32 %v497_v48, %v418_v40 }
 0x4cd   :  { %v499_v50 = vmul.f32 0.64892334, %v498_v49 }
 0x4cf   :  { %v500_v51 = vadd.f32 %v499_v50, %v497_v48 }
 0x4d1   :  { %2334 = vmatmul.mubr.msk.f32.vlgmr.msra.gmra.mxu0 %vm29_vm1, %v500_v51 }
 0x4d2   :  { %2348 = vmatpush3.msra.mxu0 %v2626_v0  ;;  %2355 = vmatprep.mubr.msk.f32.mxu0 %vm2590_vm0, %v2589_v1 }
 0x4d3   :  { %2349 = vmatprep.subr.mxu0 %v2589_v1 }
 0x4d4   :  { %2350 = vmatpush3.msra.mxu0 %v2632_v2 }
 0x4d5   :  { %2351 = vmatprep.subr.mxu0 %v2589_v1 }
 0x4d6   :  { %2352 = vmatpush3.msra.mxu0 %v2642_v3 }
 0x4d7   :  { %2353 = vmatprep.subr.mxu0 %v2589_v1 }
 0x4d8   :  { %2354 = vmatpush3.msra.mxu0 %v2651_v4 }
 0x4d9   :  { %2369 = vmatprep.subr.mxu0 %v2589_v1 }
 0x591   :  { %v570_v52 = vpop.f32.mrf.mxu0 }
 0x592   :  { %v574_v53 = vsub.f32 %v570_v52, %v2682_v6 }
 0x593   :  { %v2335_v54 = vpop.f32.mrf.mxu0 }
 0x594   :  { %v575_v55 = vsub.f32 %v500_v51, %v574_v53 }
 0x596   :  { %v576_v56 = vmax.f32 %v575_v55, 0.0 }
 0x598   :  { %v577_v57 = vsub.f32 %v576_v56, %v497_v48 }
 0x59a   :  { %v578_v58 = vmul.f32 0.68764585, %v577_v57 }
 0x59c   :  { %v579_v59 = vadd.f32 %v578_v58, %v576_v56 }
 0x59e   :  { %2345 = vmatmul.mubr.msk.f32.vlgmr.msra.gmra.mxu1 %vm29_vm1, %v579_v59 }
 0x59f   :  { %2359 = vmatpush3.msra.mxu1 %v2626_v0  ;;  %2366 = vmatprep.mubr.msk.f32.mxu1 %vm2590_vm0, %v2589_v1 }
 0x5a0   :  { %2360 = vmatprep.subr.mxu1 %v2589_v1 }
 0x5a1   :  { %2361 = vmatpush3.msra.mxu1 %v2632_v2 }
 0x5a2   :  { %2362 = vmatprep.subr.mxu1 %v2589_v1 }
 0x5a3   :  { %2363 = vmatpush3.msra.mxu1 %v2642_v3 }
 0x5a4   :  { %2364 = vmatprep.subr.mxu1 %v2589_v1 }
 0x5a5   :  { %2365 = vmatpush3.msra.mxu1 %v2651_v4 }
 0x5a6   :  { %2380 = vmatprep.subr.mxu1 %v2589_v1 }
 0x65e   :  { %v649_v60 = vpop.f32.mrf.mxu1 }
 0x65f   :  { %v653_v61 = vsub.f32 %v649_v60, %v2682_v6 }
 0x660   :  { %v2346_v62 = vpop.f32.mrf.mxu1 }
 0x661   :  { %v654_v63 = vsub.f32 %v579_v59, %v653_v61 }
 0x663   :  { %v655_v5 = vmax.f32 %v654_v63, 0.0 }
 0x665   :  { %v656_v7 = vsub.f32 %v655_v5, %v576_v56 }
 0x667   :  { %v657_v8 = vmul.f32 0.71849984, %v656_v7 }
 0x669   :  { %v658_v9 = vadd.f32 %v657_v8, %v655_v5 }
 0x66b   :  { %2356 = vmatmul.mubr.msk.f32.vlgmr.msra.gmra.mxu0 %vm29_vm1, %v658_v9 }
 0x66c   :  { %2370 = vmatpush3.msra.mxu0 %v2626_v0  ;;  %2377 = vmatprep.mubr.msk.f32.mxu0 %vm2590_vm0, %v2589_v1 }
 0x66d   :  { %2371 = vmatprep.subr.mxu0 %v2589_v1 }
 0x66e   :  { %2372 = vmatpush3.msra.mxu0 %v2632_v2 }
 0x66f   :  { %2373 = vmatprep.subr.mxu0 %v2589_v1 }
 0x670   :  { %2374 = vmatpush3.msra.mxu0 %v2642_v3 }
 0x671   :  { %2375 = vmatprep.subr.mxu0 %v2589_v1 }
 0x672   :  { %2376 = vmatpush3.msra.mxu0 %v2651_v4 }
 0x673   :  { %2391 = vmatprep.subr.mxu0 %v2589_v1 }
 0x72b   :  { %v728_v10 = vpop.f32.mrf.mxu0 }
 0x72c   :  { %v732_v11 = vsub.f32 %v728_v10, %v2682_v6 }
 0x72d   :  { %v2357_v12 = vpop.f32.mrf.mxu0 }
 0x72e   :  { %v733_v13 = vsub.f32 %v658_v9, %v732_v11 }
 0x730   :  { %v734_v14 = vmax.f32 %v733_v13, 0.0 }
 0x732   :  { %v735_v15 = vsub.f32 %v734_v14, %v655_v5 }
 0x734   :  { %v736_v16 = vmul.f32 0.743691, %v735_v15 }
 0x736   :  { %v737_v17 = vadd.f32 %v736_v16, %v734_v14 }
 0x738   :  { %2367 = vmatmul.mubr.msk.f32.vlgmr.msra.gmra.mxu1 %vm29_vm1, %v737_v17 }
 0x739   :  { %2381 = vmatpush3.msra.mxu1 %v2626_v0  ;;  %2388 = vmatprep.mubr.msk.f32.mxu1 %vm2590_vm0, %v2589_v1 }
 0x73a   :  { %2382 = vmatprep.subr.mxu1 %v2589_v1 }
 0x73b   :  { %2383 = vmatpush3.msra.mxu1 %v2632_v2 }
 0x73c   :  { %2384 = vmatprep.subr.mxu1 %v2589_v1 }
 0x73d   :  { %2385 = vmatpush3.msra.mxu1 %v2642_v3 }
 0x73e   :  { %2386 = vmatprep.subr.mxu1 %v2589_v1 }
 0x73f   :  { %2387 = vmatpush3.msra.mxu1 %v2651_v4 }
 0x740   :  { %2402 = vmatprep.subr.mxu1 %v2589_v1 }
 0x7f8   :  { %v807_v18 = vpop.f32.mrf.mxu1 }
 0x7f9   :  { %v811_v19 = vsub.f32 %v807_v18, %v2682_v6 }
 0x7fa   :  { %v2368_v20 = vpop.f32.mrf.mxu1 }
 0x7fb   :  { %v812_v21 = vsub.f32 %v737_v17, %v811_v19 }
 0x7fd   :  { %v813_v22 = vmax.f32 %v812_v21, 0.0 }
 0x7ff   :  { %v814_v23 = vsub.f32 %v813_v22, %v734_v14 }
 0x801   :  { %v815_v24 = vmul.f32 0.7646647, %v814_v23 }
 0x803   :  { %v816_v25 = vadd.f32 %v815_v24, %v813_v22 }
 0x805   :  { %2378 = vmatmul.mubr.msk.f32.vlgmr.msra.gmra.mxu0 %vm29_vm1, %v816_v25 }
 0x806   :  { %2392 = vmatpush3.msra.mxu0 %v2626_v0  ;;  %2399 = vmatprep.mubr.msk.f32.mxu0 %vm2590_vm0, %v2589_v1 }
 0x807   :  { %2393 = vmatprep.subr.mxu0 %v2589_v1 }
 0x808   :  { %2394 = vmatpush3.msra.mxu0 %v2632_v2 }
 0x809   :  { %2395 = vmatprep.subr.mxu0 %v2589_v1 }
 0x80a   :  { %2396 = vmatpush3.msra.mxu0 %v2642_v3 }
 0x80b   :  { %2397 = vmatprep.subr.mxu0 %v2589_v1 }
 0x80c   :  { %2398 = vmatpush3.msra.mxu0 %v2651_v4 }
 0x80d   :  { %2413 = vmatprep.subr.mxu0 %v2589_v1 }
 0x8c5   :  { %v886_v26 = vpop.f32.mrf.mxu0 }
 0x8c6   :  { %v890_v27 = vsub.f32 %v886_v26, %v2682_v6 }
 0x8c7   :  { %v2379_v28 = vpop.f32.mrf.mxu0 }
 0x8c8   :  { %v891_v29 = vsub.f32 %v816_v25, %v890_v27 }
 0x8ca   :  { %v892_v30 = vmax.f32 %v891_v29, 0.0 }
 0x8cc   :  { %v893_v31 = vsub.f32 %v892_v30, %v813_v22 }
 0x8ce   :  { %v894_v32 = vmul.f32 0.78240925, %v893_v31 }
 0x8d0   :  { %v895_v33 = vadd.f32 %v894_v32, %v892_v30 }
 0x8d2   :  { %2389 = vmatmul.mubr.msk.f32.vlgmr.msra.gmra.mxu1 %vm29_vm1, %v895_v33 }
 0x8d3   :  { %2403 = vmatpush3.msra.mxu1 %v2626_v0  ;;  %2410 = vmatprep.mubr.msk.f32.mxu1 %vm2590_vm0, %v2589_v1 }
 0x8d4   :  { %2404 = vmatprep.subr.mxu1 %v2589_v1 }
 0x8d5   :  { %2405 = vmatpush3.msra.mxu1 %v2632_v2 }
 0x8d6   :  { %2406 = vmatprep.subr.mxu1 %v2589_v1 }
 0x8d7   :  { %2407 = vmatpush3.msra.mxu1 %v2642_v3 }
 0x8d8   :  { %2408 = vmatprep.subr.mxu1 %v2589_v1 }
 0x8d9   :  { %2409 = vmatpush3.msra.mxu1 %v2651_v4 }
 0x8da   :  { %2424 = vmatprep.subr.mxu1 %v2589_v1 }
 0x992   :  { %v965_v34 = vpop.f32.mrf.mxu1 }
 0x993   :  { %v969_v35 = vsub.f32 %v965_v34, %v2682_v6 }
 0x994   :  { %v2390_v36 = vpop.f32.mrf.mxu1 }
 0x995   :  { %v970_v37 = vsub.f32 %v895_v33, %v969_v35 }
 0x997   :  { %v971_v38 = vmax.f32 %v970_v37, 0.0 }
 0x999   :  { %v972_v39 = vsub.f32 %v971_v38, %v892_v30 }
 0x99b   :  { %v973_v40 = vmul.f32 0.7976244, %v972_v39 }
 0x99d   :  { %v974_v41 = vadd.f32 %v973_v40, %v971_v38 }
 0x99f   :  { %2400 = vmatmul.mubr.msk.f32.vlgmr.msra.gmra.mxu0 %vm29_vm1, %v974_v41 }
 0x9a0   :  { %2414 = vmatpush3.msra.mxu0 %v2626_v0  ;;  %2421 = vmatprep.mubr.msk.f32.mxu0 %vm2590_vm0, %v2589_v1 }
 0x9a1   :  { %2415 = vmatprep.subr.mxu0 %v2589_v1 }
 0x9a2   :  { %2416 = vmatpush3.msra.mxu0 %v2632_v2 }
 0x9a3   :  { %2417 = vmatprep.subr.mxu0 %v2589_v1 }
 0x9a4   :  { %2418 = vmatpush3.msra.mxu0 %v2642_v3 }
 0x9a5   :  { %2419 = vmatprep.subr.mxu0 %v2589_v1 }
 0x9a6   :  { %2420 = vmatpush3.msra.mxu0 %v2651_v4 }
 0x9a7   :  { %2435 = vmatprep.subr.mxu0 %v2589_v1 }
 0xa5f   :  { %v1044_v42 = vpop.f32.mrf.mxu0 }
 0xa60   :  { %v1048_v43 = vsub.f32 %v1044_v42, %v2682_v6 }
 0xa61   :  { %v2401_v44 = vpop.f32.mrf.mxu0 }
 0xa62   :  { %v1049_v45 = vsub.f32 %v974_v41, %v1048_v43 }
 0xa64   :  { %v1050_v46 = vmax.f32 %v1049_v45, 0.0 }
 0xa66   :  { %v1051_v47 = vsub.f32 %v1050_v46, %v971_v38 }
 0xa68   :  { %v1052_v48 = vmul.f32 0.81082, %v1051_v47 }
 0xa6a   :  { %v1053_v49 = vadd.f32 %v1052_v48, %v1050_v46 }
 0xa6c   :  { %2411 = vmatmul.mubr.msk.f32.vlgmr.msra.gmra.mxu1 %vm29_vm1, %v1053_v49 }
 0xa6d   :  { %2425 = vmatpush3.msra.mxu1 %v2626_v0  ;;  %2432 = vmatprep.mubr.msk.f32.mxu1 %vm2590_vm0, %v2589_v1 }
 0xa6e   :  { %2426 = vmatprep.subr.mxu1 %v2589_v1 }
 0xa6f   :  { %2427 = vmatpush3.msra.mxu1 %v2632_v2 }
 0xa70   :  { %2428 = vmatprep.subr.mxu1 %v2589_v1 }
 0xa71   :  { %2429 = vmatpush3.msra.mxu1 %v2642_v3 }
 0xa72   :  { %2430 = vmatprep.subr.mxu1 %v2589_v1 }
 0xa73   :  { %2431 = vmatpush3.msra.mxu1 %v2651_v4 }
 0xa74   :  { %2446 = vmatprep.subr.mxu1 %v2589_v1 }
 0xb2c   :  { %v1123_v50 = vpop.f32.mrf.mxu1 }
 0xb2d   :  { %v1127_v51 = vsub.f32 %v1123_v50, %v2682_v6 }
 0xb2e   :  { %v2412_v52 = vpop.f32.mrf.mxu1 }
 0xb2f   :  { %v1128_v53 = vsub.f32 %v1053_v49, %v1127_v51 }
 0xb31   :  { %v1129_v54 = vmax.f32 %v1128_v53, 0.0 }
 0xb33   :  { %v1130_v55 = vsub.f32 %v1129_v54, %v1050_v46 }
 0xb35   :  { %v1131_v56 = vmul.f32 0.82237667, %v1130_v55 }
 0xb37   :  { %v1132_v57 = vadd.f32 %v1131_v56, %v1129_v54 }
 0xb39   :  { %2422 = vmatmul.mubr.msk.f32.vlgmr.msra.gmra.mxu0 %vm29_vm1, %v1132_v57 }
 0xb3a   :  { %2436 = vmatpush3.msra.mxu0 %v2626_v0  ;;  %2443 = vmatprep.mubr.msk.f32.mxu0 %vm2590_vm0, %v2589_v1 }
 0xb3b   :  { %2437 = vmatprep.subr.mxu0 %v2589_v1 }
 0xb3c   :  { %2438 = vmatpush3.msra.mxu0 %v2632_v2 }
 0xb3d   :  { %2439 = vmatprep.subr.mxu0 %v2589_v1 }
 0xb3e   :  { %2440 = vmatpush3.msra.mxu0 %v2642_v3 }
 0xb3f   :  { %2441 = vmatprep.subr.mxu0 %v2589_v1 }
 0xb40   :  { %2442 = vmatpush3.msra.mxu0 %v2651_v4 }
 0xb41   :  { %2457 = vmatprep.subr.mxu0 %v2589_v1 }
 0xbf9   :  { %v1202_v58 = vpop.f32.mrf.mxu0 }
 0xbfa   :  { %v1206_v59 = vsub.f32 %v1202_v58, %v2682_v6 }
 0xbfb   :  { %v2423_v60 = vpop.f32.mrf.mxu0 }
 0xbfc   :  { %v1207_v61 = vsub.f32 %v1132_v57, %v1206_v59 }
 0xbfe   :  { %v1208_v62 = vmax.f32 %v1207_v61, 0.0 }
 0xc00   :  { %v1209_v63 = vsub.f32 %v1208_v62, %v1129_v54 }
 0xc02   :  { %v1210_v5 = vmul.f32 0.8325844, %v1209_v63 }
 0xc04   :  { %v1211_v7 = vadd.f32 %v1210_v5, %v1208_v62 }
 0xc06   :  { %2433 = vmatmul.mubr.msk.f32.vlgmr.msra.gmra.mxu1 %vm29_vm1, %v1211_v7 }
 0xc07   :  { %2447 = vmatpush3.msra.mxu1 %v2626_v0  ;;  %2454 = vmatprep.mubr.msk.f32.mxu1 %vm2590_vm0, %v2589_v1 }
 0xc08   :  { %2448 = vmatprep.subr.mxu1 %v2589_v1 }
 0xc09   :  { %2449 = vmatpush3.msra.mxu1 %v2632_v2 }
 0xc0a   :  { %2450 = vmatprep.subr.mxu1 %v2589_v1 }
 0xc0b   :  { %2451 = vmatpush3.msra.mxu1 %v2642_v3 }
 0xc0c   :  { %2452 = vmatprep.subr.mxu1 %v2589_v1 }
 0xc0d   :  { %2453 = vmatpush3.msra.mxu1 %v2651_v4 }
 0xc0e   :  { %2468 = vmatprep.subr.mxu1 %v2589_v1 }
 0xcc6   :  { %v1281_v8 = vpop.f32.mrf.mxu1 }
 0xcc7   :  { %v1285_v9 = vsub.f32 %v1281_v8, %v2682_v6 }
 0xcc8   :  { %v2434_v10 = vpop.f32.mrf.mxu1 }
 0xcc9   :  { %v1286_v11 = vsub.f32 %v1211_v7, %v1285_v9 }
 0xccb   :  { %v1287_v12 = vmax.f32 %v1286_v11, 0.0 }
 0xccd   :  { %v1288_v13 = vsub.f32 %v1287_v12, %v1208_v62 }
 0xccf   :  { %v1289_v14 = vmul.f32 0.84166825, %v1288_v13  ;;  %v26_v13 = vld [vmem:[%s2973_s2] sm:$0xff] }
 0xcd1   :  { %v1290_v15 = vadd.f32 %v1289_v14, %v1287_v12 }
 0xcd3   :  { %2444 = vmatmul.mubr.msk.f32.vlgmr.msra.gmra.mxu0 %vm29_vm1, %v1290_v15 }
 0xcd4   :  { %2458 = vmatpush3.msra.mxu0 %v2626_v0  ;;  %2465 = vmatprep.mubr.msk.f32.mxu0 %vm2590_vm0, %v2589_v1 }
 0xcd5   :  { %2459 = vmatprep.subr.mxu0 %v2589_v1 }
 0xcd6   :  { %2460 = vmatpush3.msra.mxu0 %v2632_v2 }
 0xcd7   :  { %2461 = vmatprep.subr.mxu0 %v2589_v1 }
 0xcd8   :  { %2462 = vmatpush3.msra.mxu0 %v2642_v3 }
 0xcd9   :  { %2463 = vmatprep.subr.mxu0 %v2589_v1 }
 0xcda   :  { %2464 = vmatpush3.msra.mxu0 %v2651_v4 }
 0xcdb   :  { %2479 = vmatprep.subr.mxu0 %v2589_v1 }
 0xd93   :  { %v1360_v16 = vpop.f32.mrf.mxu0 }
 0xd94   :  { %v1364_v17 = vsub.f32 %v1360_v16, %v2682_v6 }
 0xd95   :  { %v2445_v18 = vpop.f32.mrf.mxu0 }
 0xd96   :  { %v1365_v19 = vsub.f32 %v1290_v15, %v1364_v17 }
 0xd98   :  { %v1366_v20 = vmax.f32 %v1365_v19, 0.0 }
 0xd9a   :  { %v1367_v21 = vsub.f32 %v1366_v20, %v1287_v12  ;;  %v27_v12 = vld [vmem:[%s2973_s2 + $0x8] sm:$0xff] }
 0xd9c   :  { %v1368_v22 = vmul.f32 0.84980553, %v1367_v21 }
 0xd9e   :  { %v1369_v23 = vadd.f32 %v1368_v22, %v1366_v20 }
 0xda0   :  { %2455 = vmatmul.mubr.msk.f32.vlgmr.msra.gmra.mxu1 %vm29_vm1, %v1369_v23 }
 0xda1   :  { %2469 = vmatpush3.msra.mxu1 %v2626_v0  ;;  %2476 = vmatprep.mubr.msk.f32.mxu1 %vm2590_vm0, %v2589_v1 }
 0xda2   :  { %2470 = vmatprep.subr.mxu1 %v2589_v1 }
 0xda3   :  { %2471 = vmatpush3.msra.mxu1 %v2632_v2 }
 0xda4   :  { %2472 = vmatprep.subr.mxu1 %v2589_v1 }
 0xda5   :  { %2473 = vmatpush3.msra.mxu1 %v2642_v3 }
 0xda6   :  { %2474 = vmatprep.subr.mxu1 %v2589_v1 }
 0xda7   :  { %2475 = vmatpush3.msra.mxu1 %v2651_v4 }
 0xda8   :  { %2490 = vmatprep.subr.mxu1 %v2589_v1 }
 0xe60   :  { %v1439_v24 = vpop.f32.mrf.mxu1 }
 0xe61   :  { %v1443_v25 = vsub.f32 %v1439_v24, %v2682_v6 }
 0xe62   :  { %v2456_v26 = vpop.f32.mrf.mxu1 }
 0xe63   :  { %v1444_v27 = vsub.f32 %v1369_v23, %v1443_v25 }
 0xe65   :  { %v1445_v28 = vmax.f32 %v1444_v27, 0.0 }
 0xe67   :  { %v1446_v29 = vsub.f32 %v1445_v28, %v1366_v20 }
 0xe69   :  { %v1447_v30 = vmul.f32 0.8571379, %v1446_v29 }
 0xe6b   :  { %v1448_v31 = vadd.f32 %v1447_v30, %v1445_v28 }
 0xe6d   :  { %2466 = vmatmul.mubr.msk.f32.vlgmr.msra.gmra.mxu0 %vm29_vm1, %v1448_v31 }
 0xe6e   :  { %2480 = vmatpush3.msra.mxu0 %v2626_v0  ;;  %2487 = vmatprep.mubr.msk.f32.mxu0 %vm2590_vm0, %v2589_v1 }
 0xe6f   :  { %2481 = vmatprep.subr.mxu0 %v2589_v1 }
 0xe70   :  { %2482 = vmatpush3.msra.mxu0 %v2632_v2 }
 0xe71   :  { %2483 = vmatprep.subr.mxu0 %v2589_v1 }
 0xe72   :  { %2484 = vmatpush3.msra.mxu0 %v2642_v3 }
 0xe73   :  { %2485 = vmatprep.subr.mxu0 %v2589_v1 }
 0xe74   :  { %2486 = vmatpush3.msra.mxu0 %v2651_v4 }
 0xe75   :  { %2501 = vmatprep.subr.mxu0 %v2589_v1 }
 0xf2d   :  { %v1518_v32 = vpop.f32.mrf.mxu0 }
 0xf2e   :  { %v1522_v33 = vsub.f32 %v1518_v32, %v2682_v6 }
 0xf2f   :  { %v2467_v34 = vpop.f32.mrf.mxu0 }
 0xf30   :  { %v1523_v35 = vsub.f32 %v1448_v31, %v1522_v33 }
 0xf32   :  { %v1524_v36 = vmax.f32 %v1523_v35, 0.0 }
 0xf34   :  { %v1525_v37 = vsub.f32 %v1524_v36, %v1445_v28 }
 0xf36   :  { %v1526_v38 = vmul.f32 0.86378014, %v1525_v37 }
 0xf38   :  { %v1527_v39 = vadd.f32 %v1526_v38, %v1524_v36 }
 0xf3a   :  { %2477 = vmatmul.mubr.msk.f32.vlgmr.msra.gmra.mxu1 %vm29_vm1, %v1527_v39 }
 0xf3b   :  { %2491 = vmatpush3.msra.mxu1 %v2626_v0  ;;  %2498 = vmatprep.mubr.msk.f32.mxu1 %vm2590_vm0, %v2589_v1 }
 0xf3c   :  { %2492 = vmatprep.subr.mxu1 %v2589_v1 }
 0xf3d   :  { %2493 = vmatpush3.msra.mxu1 %v2632_v2 }
 0xf3e   :  { %2494 = vmatprep.subr.mxu1 %v2589_v1 }
 0xf3f   :  { %2495 = vmatpush3.msra.mxu1 %v2642_v3 }
 0xf40   :  { %2496 = vmatprep.subr.mxu1 %v2589_v1 }
 0xf41   :  { %2497 = vmatpush3.msra.mxu1 %v2651_v4 }
 0xf42   :  { %2512 = vmatprep.subr.mxu1 %v2589_v1 }
 0xffa   :  { %v1597_v40 = vpop.f32.mrf.mxu1 }
 0xffb   :  { %v1601_v41 = vsub.f32 %v1597_v40, %v2682_v6 }
 0xffc   :  { %v2478_v42 = vpop.f32.mrf.mxu1 }
 0xffd   :  { %v1602_v43 = vsub.f32 %v1527_v39, %v1601_v41 }
 0xfff   :  { %v1603_v44 = vmax.f32 %v1602_v43, 0.0 }
0x1001   :  { %2488 = vmatmul.mubr.msk.f32.vlgmr.msra.gmra.mxu0 %vm29_vm1, %v1603_v44 }
0x1002   :  { %2502 = vmatpush3.msra.mxu0 %v2626_v0  ;;  %2509 = vmatprep.mubr.msk.f32.mxu0 %vm2590_vm0, %v2589_v1 }
0x1003   :  { %2503 = vmatprep.subr.mxu0 %v2589_v1 }
0x1004   :  { %2504 = vmatpush3.msra.mxu0 %v2632_v2 }
0x1005   :  { %2505 = vmatprep.subr.mxu0 %v2589_v1 }
0x1006   :  { %2506 = vmatpush3.msra.mxu0 %v2642_v3 }
0x1007   :  { %2507 = vmatprep.subr.mxu0 %v2589_v1 }
0x1008   :  { %2508 = vmatpush3.msra.mxu0 %v2651_v4 }
0x1009   :  { %2523 = vmatprep.subr.mxu0 %v2589_v1 }
0x10c1   :  { %v1673_v45 = vpop.f32.mrf.mxu0 }
0x10c2   :  { %v1677_v46 = vsub.f32 %v1673_v45, %v2682_v6 }
0x10c3   :  { %v2489_v47 = vpop.f32.mrf.mxu0 }
0x10c4   :  { %v1678_v48 = vsub.f32 %v1603_v44, %v1677_v46 }
0x10c6   :  { %v1679_v49 = vmax.f32 %v1678_v48, 0.0 }
0x10c8   :  { %2499 = vmatmul.mubr.msk.f32.vlgmr.msra.gmra.mxu1 %vm29_vm1, %v1679_v49 }
0x10c9   :  { %2513 = vmatpush3.msra.mxu1 %v2626_v0  ;;  %2520 = vmatprep.mubr.msk.f32.mxu1 %vm2590_vm0, %v2589_v1 }
0x10ca   :  { %2514 = vmatprep.subr.mxu1 %v2589_v1 }
0x10cb   :  { %2515 = vmatpush3.msra.mxu1 %v2632_v2 }
0x10cc   :  { %2516 = vmatprep.subr.mxu1 %v2589_v1 }
0x10cd   :  { %2517 = vmatpush3.msra.mxu1 %v2642_v3 }
0x10ce   :  { %2518 = vmatprep.subr.mxu1 %v2589_v1 }
0x10cf   :  { %2519 = vmatpush3.msra.mxu1 %v2651_v4 }
0x10d0   :  { %2534 = vmatprep.subr.mxu1 %v2589_v1 }
0x1188   :  { %v1749_v50 = vpop.f32.mrf.mxu1 }
0x1189   :  { %v1753_v51 = vsub.f32 %v1749_v50, %v2682_v6 }
0x118a   :  { %v2500_v52 = vpop.f32.mrf.mxu1 }
0x118b   :  { %v1754_v53 = vsub.f32 %v1679_v49, %v1753_v51 }
0x118d   :  { %v1755_v54 = vmax.f32 %v1754_v53, 0.0 }
0x118f   :  { %v1756_v55 = vsub.f32 %v1755_v54, %v1679_v49 }
0x1191   :  { %v1757_v56 = vmul.f32 0.2817535, %v1756_v55 }
0x1193   :  { %v1758_v57 = vadd.f32 %v1757_v56, %v1755_v54 }
0x1195   :  { %2510 = vmatmul.mubr.msk.f32.vlgmr.msra.gmra.mxu0 %vm29_vm1, %v1758_v57 }
0x1196   :  { %2524 = vmatpush3.msra.mxu0 %v2626_v0  ;;  %2531 = vmatprep.mubr.msk.f32.mxu0 %vm2590_vm0, %v2589_v1 }
0x1197   :  { %2525 = vmatprep.subr.mxu0 %v2589_v1 }
0x1198   :  { %2526 = vmatpush3.msra.mxu0 %v2632_v2 }
0x1199   :  { %2527 = vmatprep.subr.mxu0 %v2589_v1 }
0x119a   :  { %2528 = vmatpush3.msra.mxu0 %v2642_v3 }
0x119b   :  { %2529 = vmatprep.subr.mxu0 %v2589_v1 }
0x119c   :  { %2530 = vmatpush3.msra.mxu0 %v2651_v4 }
0x1255   :  { %v1828_v58 = vpop.f32.mrf.mxu0 }
0x1256   :  { %v1832_v59 = vsub.f32 %v1828_v58, %v2682_v6 }
0x1257   :  { %v2511_v60 = vpop.f32.mrf.mxu0 }
0x1258   :  { %v1833_v0 = vsub.f32 %v1758_v57, %v1832_v59 }
0x125a   :  { %v1834_v61 = vmax.f32 %v1833_v0, 0.0 }
0x125c   :  { %v1835_v62 = vsub.f32 %v1834_v61, %v1755_v54 }
0x125e   :  { %v1836_v63 = vmul.f32 0.43404278, %v1835_v62 }
0x1260   :  { %v1837_v5 = vadd.f32 %v1836_v63, %v1834_v61 }
0x1262   :  { %2521 = vmatmul.mubr.msk.f32.vlgmr.msra.gmra.mxu1 %vm29_vm1, %v1837_v5 }
0x1263   :  { %2538 = vmatprep.mubr.msk.f32.mxu1 %vm2590_vm0, %v2589_v1  ;;  %2535 = vmatpush3.xpose.msk.msra.mxu1 %vm29_vm1, %v27_v12 }
0x1264   :  { %2536 = vmatprep.subr.mxu1 %v2589_v1 }
0x1267   :  { %2537 = vmatpush3.xpose.msk.msra.mxu1 %vm29_vm1, %v26_v13 }
0x1322   :  { %v1907_v2 = vpop.f32.mrf.mxu1 }
0x1323   :  { %v1911_v3 = vsub.f32 %v1907_v2, %v2682_v6 }
0x1324   :  { %v2522_v7 = vpop.f32.mrf.mxu1 }
0x1325   :  { %v1912_v8 = vsub.f32 %v1837_v5, %v1911_v3 }
0x1327   :  { %v1913_v4 = vmax.f32 %v1912_v8, 0.0 }
0x1329   :  { %v1914_v9 = vsub.f32 %v1913_v4, %v1834_v61 }
0x132b   :  { %v1915_v10 = vmul.f32 0.5310638, %v1914_v9 }
0x132d   :  { %v1916_v11 = vadd.f32 %v1915_v10, %v1913_v4 }
0x132f   :  { %2532 = vmatmul.mubr.msk.f32.vlgmr.msra.gmra.mxu0 %vm29_vm1, %v1916_v11 }
0x13ef   :  { %v1986_v14 = vpop.f32.mrf.mxu0 }
0x13f0   :  { %v1990_v15 = vsub.f32 %v1986_v14, %v2682_v6 }
0x13f1   :  { %v2533_v16 = vpop.f32.mrf.mxu0 }
0x13f2   :  { %v1991_v17 = vsub.f32 %v1916_v11, %v1990_v15 }
0x13f4   :  { %v1992_v18 = vmax.f32 %v1991_v17, 0.0 }
0x13f6   :  { %1993 = vst.msk [vmem:[#allocation4] sm:$0xff] %vm29_vm1, %v1992_v18  ;;  %2539 = vmatmul.mubr.msk.f32.vlgmr.msra.gmra.mxu1 %vm29_vm1, %v1992_v18 }
0x13f7   :  { %2556 = shalt.err (!%p2553_p4)
}
0x13f8   :  { %2094 = dma.vmem_to_hbm [thread:$0]  %s2092_s7, 128, %s2976_s5, [#allocation5]   ;;  %vm2073_vm2 = vcmask 130048  }
0x13f9   :  { %s2592_s10 = smov [#allocation2]  }
0x13fa   :  { %s2081_s11 = sshll.u32 %s2592_s10, 4  ;;  %s2082_s11 = int_to_ptr.vmem [resolvable:$true] %s2081_s11 }
0x13fb   :  { %s2565_s12 = scalar_lea.vmem %s2082_s11, 128  ;;  %p2570_p6 = scmp.lt.s32.totalorder %s2082_s11, %s2082_s11 }
0x13fc   :  { %p2566_p5 = scmp.ne.s32.totalorder %s2082_s11, %s2565_s12  ;;  %p2571_p7 = scmp.lt.s32.totalorder %s2565_s12, %s2565_s12 }
0x13fe   :  { %p2572_p8 = por %p2571_p7, %p2570_p6 }
0x1400   :  { %p2573_p9 = pnand %p2572_p8, %p2566_p5 }
0x14b6   :  { %v2069_v1 = vpop.f32.mrf.mxu1 }
0x14b7   :  { %2074 = vst.msk [vmem:[#allocation2] sm:$0xff] %vm2073_vm2, %v2069_v1 }
0x14b8   :  { %v2540_v6 = vpop.f32.mrf.mxu1 }
0x14b9   :  { %2576 = shalt.err (!%p2573_p9)
}
0x14ba   :  { %2084 = dma.vmem_to_hbm [thread:$0]  %s2082_s11, 128, %s2975_s4, [#allocation3]  }
0x14bb   :  { %2585 = dma.done.wait [#allocation3], 128  }
0x14bc   :  { %2586 = vsyncadd [#allocation3], 4294967168 }
0x14bd   :  { %2587 = dma.done.wait [#allocation5], 128  }
0x14be   :  { %2588 = vsyncadd [#allocation5], 4294967168 }
0x14bf   :  { %2101 = vsyncpa [#allocation3], 1 }
0x14c0   :  { %2102 = vsyncpa [#allocation5], 1 }

</bundles_post_ra>
